<compile_context>
chip_gen: v6e
topology: v6e:2x2x1
jax: 0.10.0
libtpu: 0.0.40
codegen_flags: <defaults>
</compile_context>

<pallas_src>
import numpy as np
import jax
import jax.numpy as jnp
from jax.experimental import pallas as pl
from jax.experimental.pallas import tpu as pltpu

# ----------------------------- small config ---------------------------------
B = 2           # batch
CIN = 3         # image channels
IMG = 16        # image spatial size
POOL = 4        # adaptive max pool output size (stand-in for 14)
ENC = 32        # encoder_dim
DEC = 32        # decoder_dim
ATT = 32        # attention_dim
EMB = 16        # embed_dim
VOCAB = 64      # vocab_size
SEQ = 8         # caption sequence length
NPIX = POOL * POOL
OUTW = 128      # lane-dense packed decoder output width (>= VOCAB + NPIX)
HFUSE = ATT + ENC + 4 * DEC   # fused h-projection width


# ------------------------------- kernels -------------------------------------
def encoder_kernel(p_ref, w_ref, b_ref, out_ref):
    """One im2col matmul (B*H*W, 27) x (27, ENC) + ReLU + adaptive max pool.

    p_ref:   (B*IMG*IMG, 9*CIN)   im2col patches (built in wrapper)
    w_ref:   (9*CIN, ENC)
    b_ref:   (1, ENC)
    out_ref: (B, NPIX, ENC)       flattened NHWC features
    """
    acc = jnp.dot(p_ref[...], w_ref[...],
                  preferred_element_type=jnp.float32) + b_ref[...]
    acc = jnp.maximum(acc, 0.0)
    y = acc.reshape(B, IMG, IMG, ENC)
    sw = IMG // POOL
    y = jnp.max(y.reshape(B, IMG, POOL, sw, ENC), axis=3)    # (B, IMG, POOL, ENC)
    y = jnp.max(y.reshape(B, POOL, sw, POOL, ENC), axis=2)   # (B, POOL, POOL, ENC)
    out_ref[...] = y.reshape(B, NPIX, ENC)


def decoder_seq_kernel(
    bt_ref,                                  # scalar prefetch: (T,) active batch per step
    enc_ref, emb_ref,                        # encoder_out, per-step embeddings
    wh_ref, bh_ref,                          # fused [dec_att | f_beta | W_hh] (+ b_ih folded)
    wihe_ref, wiha_ref,                      # W_ih split: embed part, awe part
    we_ref, be_ref,                          # attention.encoder_att
    wf_ref, bf_ref,                          # attention.full_att  (wf: (ATT,1), bf: (1,1))
    ihw_ref, ihb_ref, icw_ref, icb_ref,      # init_h / init_c
    wo_ref, bo_ref,                          # output linear
    out_ref,                                 # (1, B, OUTW) packed [preds | alpha | pad]
    h_scr, c_scr,                            # VMEM scratch, persist across grid steps
):
    t = pl.program_id(0)
    enc = enc_ref[...]                       # (B, P, E)
    Bk, P, E = enc.shape
    A = we_ref.shape[1]
    D = h_scr.shape[1]

    # ---- init hidden state at the first timestep ----
    @pl.when(t == 0)
    def _():
        mean_enc = jnp.mean(enc, axis=1)                                  # (B, E)
        h_scr[...] = jnp.dot(mean_enc, ihw_ref[...],
                             preferred_element_type=jnp.float32) + ihb_ref[...]
        c_scr[...] = jnp.dot(mean_enc, icw_ref[...],
                             preferred_element_type=jnp.float32) + icb_ref[...]

    h = h_scr[...]
    c = c_scr[...]

    bt = bt_ref[t]
    row_ids = jax.lax.broadcasted_iota(jnp.int32, (Bk, 1), 0)
    active = row_ids < bt                                                 # (B, 1)

    # ---- fused h projection: [att2 | f_beta gate | hh gates (+b_ih+b_hh)] ----
    h_all = jnp.dot(h, wh_ref[...], preferred_element_type=jnp.float32) + bh_ref[...]
    att2 = h_all[:, 0:A]                                                  # (B, A)
    gate = jax.nn.sigmoid(h_all[:, A:A + E])                              # (B, E)
    hh_gates = h_all[:, A + E:]                                           # (B, 4D)

    # ---- attention ----
    att1 = (jnp.dot(enc.reshape(Bk * P, E), we_ref[...],
                    preferred_element_type=jnp.float32) + be_ref[...]).reshape(Bk, P, A)
    att_pre = jnp.maximum(att1 + att2[:, None, :], 0.0)                   # (B, P, A)
    att = (jnp.dot(att_pre.reshape(Bk * P, A), wf_ref[...],
                   preferred_element_type=jnp.float32).reshape(Bk, P) + bf_ref[...])
    att = att - jnp.max(att, axis=1, keepdims=True)
    e_att = jnp.exp(att)
    alpha = e_att * pl.reciprocal(jnp.sum(e_att, axis=1, keepdims=True), approx=True)
    awe = jnp.sum(enc * alpha[:, :, None], axis=1)                        # (B, E)
    awe = gate * awe

    # ---- LSTM cell (PyTorch gate order: i, f, g, o); concat avoided ----
    emb = emb_ref[0]                                                      # (B, EMB)
    gates = (jnp.dot(emb, wihe_ref[...], preferred_element_type=jnp.float32)
             + jnp.dot(awe, wiha_ref[...], preferred_element_type=jnp.float32)
             + hh_gates)
    i_g = jax.nn.sigmoid(gates[:, 0:D])
    f_g = jax.nn.sigmoid(gates[:, D:2 * D])
    g_g = jnp.tanh(gates[:, 2 * D:3 * D])
    o_g = jax.nn.sigmoid(gates[:, 3 * D:4 * D])
    c_new = f_g * c + i_g * g_g
    h_new = o_g * jnp.tanh(c_new)

    # masked state update: inactive rows keep old state (never read again,
    # matches PyTorch's [:batch_size_t] slicing)
    h_scr[...] = jnp.where(active, h_new, h)
    c_scr[...] = jnp.where(active, c_new, c)

    # ---- output projection (dropout = identity, see TODO above) ----
    preds = jnp.dot(h_new, wo_ref[...],
                    preferred_element_type=jnp.float32) + bo_ref[...]     # (B, VOCAB)

    # lane-dense packed output: [preds | alpha | zero pad], inactive rows zeroed
    pad = jnp.zeros((Bk, OUTW - VOCAB - NPIX), jnp.float32)
    packed = jnp.concatenate([preds, alpha, pad], axis=-1)                # (B, OUTW)
    out_ref[0] = jnp.where(active, packed, 0.0)


# --------------------------- parameter init ----------------------------------
def _linear_params(key, fan_in, fan_out):
    kw, kb = jax.random.split(key)
    bound = 1.0 / np.sqrt(fan_in)
    w = jax.random.uniform(kw, (fan_in, fan_out), jnp.float32, -bound, bound)
    b = jax.random.uniform(kb, (1, fan_out), jnp.float32, -bound, bound)
    return w, b


def init_params(key):
    keys = jax.random.split(key, 12)
    p = {}
    # encoder stand-in conv (HWIO)
    cb = 1.0 / np.sqrt(CIN * 9)
    p['conv_w'] = jax.random.uniform(keys[0], (3, 3, CIN, ENC), jnp.float32, -cb, cb)
    p['conv_b'] = jax.random.uniform(keys[1], (1, ENC), jnp.float32, -cb, cb)
    # embedding (nn.Embedding default ~ N(0, 1))
    p['embedding'] = jax.random.normal(keys[2], (VOCAB, EMB), jnp.float32)
    # attention
    p['enc_att_w'], p['enc_att_b'] = _linear_params(keys[3], ENC, ATT)
    p['dec_att_w'], p['dec_att_b'] = _linear_params(keys[4], DEC, ATT)
    fb = 1.0 / np.sqrt(ATT)
    kfa, kfb = jax.random.split(keys[5])
    p['full_att_w'] = jax.random.uniform(kfa, (ATT, 1), jnp.float32, -fb, fb)
    p['full_att_b'] = jax.random.uniform(kfb, (1, 1), jnp.float32, -fb, fb)
    # decoder linears
    p['init_h_w'], p['init_h_b'] = _linear_params(keys[6], ENC, DEC)
    p['init_c_w'], p['init_c_b'] = _linear_params(keys[7], ENC, DEC)
    p['f_beta_w'], p['f_beta_b'] = _linear_params(keys[8], DEC, ENC)
    p['out_w'], p['out_b'] = _linear_params(keys[9], DEC, VOCAB)
    # LSTMCell(EMB+ENC -> DEC), PyTorch init bound 1/sqrt(hidden), gate order i,f,g,o
    lb = 1.0 / np.sqrt(DEC)
    k0, k1, k2, k3 = jax.random.split(keys[10], 4)
    p['lstm_w_ih'] = jax.random.uniform(k0, (EMB + ENC, 4 * DEC), jnp.float32, -lb, lb)
    p['lstm_b_ih'] = jax.random.uniform(k1, (1, 4 * DEC), jnp.float32, -lb, lb)
    p['lstm_w_hh'] = jax.random.uniform(k2, (DEC, 4 * DEC), jnp.float32, -lb, lb)
    p['lstm_b_hh'] = jax.random.uniform(k3, (1, 4 * DEC), jnp.float32, -lb, lb)
    return p


# ------------------------------ forward pass ---------------------------------
def image_captioner_forward(params, images, captions, caption_lengths):
    """images: (B, 3, IMG, IMG) NCHW; captions: (SEQ, B) int32;
    caption_lengths: python list of ints (len B)."""
    # ---- Encoder: im2col in the wrapper, one K=27 matmul in-kernel ----
    x = jnp.transpose(images, (0, 2, 3, 1))                      # NCHW -> NHWC
    x_pad = jnp.pad(x, ((0, 0), (1, 1), (1, 1), (0, 0)))
    patches = jnp.concatenate(
        [x_pad[:, kh:kh + IMG, kw:kw + IMG, :] for kh in range(3) for kw in range(3)],
        axis=-1).reshape(B * IMG * IMG, 9 * CIN)
    conv_w_flat = params['conv_w'].reshape(9 * CIN, ENC)

    encoder_out = pl.pallas_call(
        encoder_kernel,
        out_shape=jax.ShapeDtypeStruct((B, NPIX, ENC), jnp.float32),
        in_specs=[pl.BlockSpec(memory_space=pltpu.MemorySpace.VMEM)] * 3,
        out_specs=pl.BlockSpec(memory_space=pltpu.MemorySpace.VMEM),
    )(patches, conv_w_flat, params['conv_b'])                    # (B, NPIX, ENC)

    num_pixels = NPIX

    # ---- Decoder setup (host-side only: sorting + static schedule) ----
    cap_len = np.asarray(caption_lengths)
    sort_ind = np.argsort(-cap_len, kind='stable')               # descending sort
    cap_len_sorted = cap_len[sort_ind]
    sort_ind_j = jnp.asarray(sort_ind, dtype=jnp.int32)
    encoder_out = encoder_out[sort_ind_j]
    encoded_captions = jnp.transpose(captions, (1, 0))[sort_ind_j]           # (B, SEQ)
    embeddings = jnp.take(params['embedding'], encoded_captions, axis=0)     # (B, SEQ, EMB)

    decode_lengths = (cap_len_sorted - 1).tolist()
    T = max(decode_lengths) - 1                                  # matches PyTorch module
    bt_arr = jnp.asarray(
        [sum(l > t for l in decode_lengths) for t in range(T)], dtype=jnp.int32)

    emb_seq = jnp.transpose(embeddings[:, :T, :], (1, 0, 2))     # (T, B, EMB)

    # Fused weights (h-LHS matmuls fused; b_ih folded into the hh bias slice).
    wh_fused = jnp.concatenate(
        [params['dec_att_w'], params['f_beta_w'], params['lstm_w_hh']], axis=1)   # (DEC, HFUSE)
    bh_fused = jnp.concatenate(
        [params['dec_att_b'], params['f_beta_b'],
         params['lstm_b_hh'] + params['lstm_b_ih']], axis=1)                      # (1, HFUSE)
    wih_e = params['lstm_w_ih'][:EMB]                            # (EMB, 4*DEC)
    wih_a = params['lstm_w_ih'][EMB:]                            # (ENC, 4*DEC)

    const = lambda t, bt: (0, 0)                                 # resident weight blocks
    grid_spec = pltpu.PrefetchScalarGridSpec(
        num_scalar_prefetch=1,
        grid=(T,),
        in_specs=[
            pl.BlockSpec((B, NPIX, ENC), lambda t, bt: (0, 0, 0)),   # encoder_out (resident)
            pl.BlockSpec((1, B, EMB), lambda t, bt: (t, 0, 0)),      # per-step embeddings
            pl.BlockSpec((DEC, HFUSE), const),                       # fused h weights
            pl.BlockSpec((1, HFUSE), const),
            pl.BlockSpec((EMB, 4 * DEC), const),                     # W_ih (embed part)
            pl.BlockSpec((ENC, 4 * DEC), const),                     # W_ih (awe part)
            pl.BlockSpec((ENC, ATT), const),                         # encoder_att
            pl.BlockSpec((1, ATT), const),
            pl.BlockSpec((ATT, 1), const),                           # full_att
            pl.BlockSpec((1, 1), const),
            pl.BlockSpec((ENC, DEC), const),                         # init_h
            pl.BlockSpec((1, DEC), const),
            pl.BlockSpec((ENC, DEC), const),                         # init_c
            pl.BlockSpec((1, DEC), const),
            pl.BlockSpec((DEC, VOCAB), const),                       # output linear
            pl.BlockSpec((1, VOCAB), const),
        ],
        out_specs=pl.BlockSpec((1, B, OUTW), lambda t, bt: (t, 0, 0)),
        scratch_shapes=[pltpu.VMEM((B, DEC), jnp.float32),           # h
                        pltpu.VMEM((B, DEC), jnp.float32)],          # c
    )

    packed = pl.pallas_call(
        decoder_seq_kernel,
        out_shape=jax.ShapeDtypeStruct((T, B, OUTW), jnp.float32),
        grid_spec=grid_spec,
        compiler_params=pltpu.CompilerParams(
            dimension_semantics=("arbitrary",)),                 # recurrence over time
    )(bt_arr, encoder_out, emb_seq, wh_fused, bh_fused, wih_e, wih_a,
      params['enc_att_w'], params['enc_att_b'],
      params['full_att_w'], params['full_att_b'],
      params['init_h_w'], params['init_h_b'],
      params['init_c_w'], params['init_c_b'],
      params['out_w'], params['out_b'])

    predictions = jnp.transpose(packed[:, :, :VOCAB], (1, 0, 2))             # (B, T, VOCAB)
    alphas = jnp.transpose(packed[:, :, VOCAB:VOCAB + num_pixels], (1, 0, 2))  # (B, T, P)

    return (predictions,
            encoded_captions,
            jnp.asarray(cap_len_sorted, dtype=jnp.int32),
            alphas,
            sort_ind_j)


# ---------------------------------- main --------------------------------------
if __name__ == "__main__":
    key = jax.random.PRNGKey(0)
    k_params, k_img, k_cap = jax.random.split(key, 3)

    params = init_params(k_params)
    images = jax.random.normal(k_img, (B, CIN, IMG, IMG), jnp.float32)   # NCHW
    captions = jax.random.randint(k_cap, (SEQ, B), 0, VOCAB, jnp.int32)  # (T, B)
    caption_lengths = [6, 8]

    outputs = image_captioner_forward(params, images, captions, caption_lengths)
    jax.block_until_ready(outputs)

    preds, enc_caps, cap_lens, alphas, sort_ind = outputs
    T_expected = max(l - 1 for l in caption_lengths) - 1
    assert preds.shape == (B, T_expected, VOCAB)
    assert alphas.shape == (B, T_expected, NPIX)
    assert enc_caps.shape == (B, SEQ)
    assert cap_lens.shape == (B,)
    print("KERNEL_OK")
</pallas_src>

<mosaic_0001>
module attributes {stable_mosaic.version = 11 : i64} {
  func.func @encoder_kernel(%arg0: memref<512x27xf32, #tpu.memory_space<vmem>>, %arg1: memref<27x32xf32, #tpu.memory_space<vmem>>, %arg2: memref<1x32xf32, #tpu.memory_space<vmem>>, %arg3: memref<2x16x32xf32, #tpu.memory_space<vmem>>) attributes {dimension_semantics = [], scalar_prefetch = 0 : i64, scratch_operands = 0 : i64, tpu.core_type = #tpu.core_type<tc>} {
    %c0 = arith.constant 0 : index
    %c0_0 = arith.constant 0 : index
    %0 = vector.load %arg0[%c0, %c0_0] : memref<512x27xf32, #tpu.memory_space<vmem>>, vector<512x27xf32>
    %c0_1 = arith.constant 0 : index
    %c0_2 = arith.constant 0 : index
    %1 = vector.load %arg1[%c0_1, %c0_2] : memref<27x32xf32, #tpu.memory_space<vmem>>, vector<27x32xf32>
    %cst = arith.constant dense<0.000000e+00> : vector<512x32xf32>
    %2 = tpu.matmul %0, %1, %cst {dimension_numbers = #tpu.dot_dimension_numbers<[1], [0], [0], [1], [0, 0, 1, 1], [], []>} : vector<512x27xf32>, vector<27x32xf32>, vector<512x32xf32> -> vector<512x32xf32>
    %c0_3 = arith.constant 0 : index
    %c0_4 = arith.constant 0 : index
    %3 = vector.load %arg2[%c0_3, %c0_4] : memref<1x32xf32, #tpu.memory_space<vmem>>, vector<1x32xf32>
    %4 = vector.broadcast %3 : vector<1x32xf32> to vector<512x32xf32>
    %5 = arith.addf %2, %4 : vector<512x32xf32>
    %cst_5 = arith.constant 0.000000e+00 : f32
    %6 = vector.broadcast %cst_5 : f32 to vector<512x32xf32>
    %7 = arith.maximumf %5, %6 : vector<512x32xf32>
    %8 = vector.shape_cast %7 : vector<512x32xf32> to vector<2x16x16x32xf32>
    %9 = vector.shape_cast %8 : vector<2x16x16x32xf32> to vector<2x16x4x4x32xf32>
    %cst_6 = arith.constant dense<0xFF800000> : vector<2x16x4x32xf32>
    %10 = vector.multi_reduction <maximumf>, %9, %cst_6 [3] : vector<2x16x4x4x32xf32> to vector<2x16x4x32xf32>
    %11 = vector.shape_cast %10 : vector<2x16x4x32xf32> to vector<2x4x4x4x32xf32>
    %cst_7 = arith.constant dense<0xFF800000> : vector<2x4x4x32xf32>
    %12 = vector.multi_reduction <maximumf>, %11, %cst_7 [2] : vector<2x4x4x4x32xf32> to vector<2x4x4x32xf32>
    %13 = vector.shape_cast %12 : vector<2x4x4x32xf32> to vector<2x16x32xf32>
    %c0_8 = arith.constant 0 : index
    %c0_9 = arith.constant 0 : index
    %c0_10 = arith.constant 0 : index
    %14 = vector.load %arg3[%c0_8, %c0_9, %c0_10] : memref<2x16x32xf32, #tpu.memory_space<vmem>>, vector<2x16x32xf32>
    tpu.vector_store %arg3[%c0_8, %c0_9, %c0_10], %13 {strides = array<i32>} : memref<2x16x32xf32, #tpu.memory_space<vmem>>, vector<2x16x32xf32>,
    return
  }
}

</mosaic_0001>

<bundles_post_ra>
// kernel: tpu_custom_call.1
= control target key start
LH: loop header
LB: loop body
LE: loop exit
PB: predicated region body
PF: predicated region fallthrough
CT: control target
= control target key end

     0   :  { %vm283_vm0 = vcmask 1042432   ;;  %vm90_vm1 = vcmask 220160   ;;  %s3519_s0 = inlined_call_operand.vmem [shape: f32[512,27], index: 0, kind: input, shape index: {}]   ;;  %s3520_s1 = inlined_call_operand.vmem [shape: f32[27,32], index: 1, kind: input, shape index: {}]   ;;  %s3521_s2 = inlined_call_operand.vmem [shape: f32[1,32], index: 2, kind: input, shape index: {}]   ;;  %s3522_s3 = inlined_call_operand.hbm [shape: f32[2,16,32], index: 3, kind: output, shape index: {}]  }
   0x1   :  { %v82_v0 = vld [vmem:[%s3520_s1 + $0x18] sm:$0x7]  ;;  %v81_v1 = vld [vmem:[%s3520_s1 + $0x10] sm:$0xff]  ;;  %v80_v2 = vld [vmem:[%s3520_s1 + $0x8] sm:$0xff] }
   0x2   :  { %2275 = vmatprep.subr.msk.mxu0 %vm283_vm0, %v82_v0  ;;  %2379 = vmatprep.subr.msk.mxu1 %vm283_vm0, %v82_v0  ;;  %v79_v3 = vld [vmem:[%s3520_s1] sm:$0xff]  ;;  %v16_v6 = vld [vmem:[%s3519_s0 + $0x8] sm:$0xff]  ;;  %v17_v8 = vld [vmem:[%s3519_s0 + $0x10] sm:$0xff] }
   0x3   :  { %2276 = vmatpush3.msk.msra.mxu0 %vm283_vm0, %v82_v0  ;;  %2383 = vmatpush3.msk.msra.mxu1 %vm283_vm0, %v82_v0  ;;  %v15_v4 = vld [vmem:[%s3519_s0] sm:$0xff]  ;;  %v48_v7 = vld [vmem:[%s3519_s0 + $0x108] sm:$0xff]  ;;  %v49_v9 = vld [vmem:[%s3519_s0 + $0x110] sm:$0xff] }
   0x4   :  { %2277 = vmatprep.subr.mxu0 %v81_v1  ;;  %2380 = vmatprep.subr.mxu1 %v81_v1  ;;  %v47_v5 = vld [vmem:[%s3519_s0 + $0x100] sm:$0xff]  ;;  %v18_v10 = vld [vmem:[%s3519_s0 + $0x18] sm:$0xff]  ;;  %v20_v14 = vld [vmem:[%s3519_s0 + $0x28] sm:$0xff] }
   0x5   :  { %2278 = vmatpush3.msra.mxu0 %v81_v1  ;;  %2384 = vmatpush3.msra.mxu1 %v81_v1  ;;  %v50_v11 = vld [vmem:[%s3519_s0 + $0x118] sm:$0xff]  ;;  %v19_v12 = vld [vmem:[%s3519_s0 + $0x20] sm:$0xff]  ;;  %v52_v15 = vld [vmem:[%s3519_s0 + $0x128] sm:$0xff] }
   0x6   :  { %2279 = vmatprep.subr.mxu0 %v80_v2  ;;  %2381 = vmatprep.subr.mxu1 %v80_v2  ;;  %v51_v13 = vld [vmem:[%s3519_s0 + $0x120] sm:$0xff]  ;;  %v21_v16 = vld [vmem:[%s3519_s0 + $0x30] sm:$0xff]  ;;  %v22_v18 = vld [vmem:[%s3519_s0 + $0x38] sm:$0xff] }
   0x7   :  { %2280 = vmatpush3.msra.mxu0 %v80_v2  ;;  %2385 = vmatpush3.msra.mxu1 %v80_v2  ;;  %v53_v17 = vld [vmem:[%s3519_s0 + $0x130] sm:$0xff]  ;;  %v54_v19 = vld [vmem:[%s3519_s0 + $0x138] sm:$0xff]  ;;  %v23_v20 = vld [vmem:[%s3519_s0 + $0x40] sm:$0xff] }
   0x8   :  { %2281 = vmatprep.subr.mxu0 %v79_v3  ;;  %2382 = vmatprep.subr.mxu1 %v79_v3  ;;  %v55_v21 = vld [vmem:[%s3519_s0 + $0x140] sm:$0xff] }
   0x9   :  { %2282 = vmatpush3.msra.mxu0 %v79_v3  ;;  %2386 = vmatpush3.msra.mxu1 %v79_v3 }
   0xa   :  { %2283 = vmatprep.mubr.msk.f32.mxu0 %vm90_vm1, %v15_v4  ;;  %2331 = vmatprep.mubr.msk.f32.mxu1 %vm90_vm1, %v47_v5 }
   0xb   :  { %2284 = vmatmul.mubr.msk.f32.vlgmr.msra.gmra.mxu0 %vm90_vm1, %v16_v6  ;;  %2332 = vmatmul.mubr.msk.f32.vlgmr.msra.gmra.mxu1 %vm90_vm1, %v48_v7 }
   0xc   :  { %2286 = vmatprep.mubr.msk.f32.mxu0 %vm90_vm1, %v17_v8  ;;  %2334 = vmatprep.mubr.msk.f32.mxu1 %vm90_vm1, %v49_v9 }
   0xf   :  { %2287 = vmatmul.mubr.msk.f32.gmra.mxu0 %vm90_vm1, %v18_v10  ;;  %2335 = vmatmul.mubr.msk.f32.gmra.mxu1 %vm90_vm1, %v50_v11 }
  0x10   :  { %2289 = vmatprep.mubr.msk.f32.mxu0 %vm90_vm1, %v19_v12  ;;  %2337 = vmatprep.mubr.msk.f32.mxu1 %vm90_vm1, %v51_v13 }
  0x13   :  { %2290 = vmatmul.mubr.msk.f32.gmra.mxu0 %vm90_vm1, %v20_v14  ;;  %2338 = vmatmul.mubr.msk.f32.gmra.mxu1 %vm90_vm1, %v52_v15 }
  0x14   :  { %2292 = vmatprep.mubr.msk.f32.mxu0 %vm90_vm1, %v21_v16  ;;  %2340 = vmatprep.mubr.msk.f32.mxu1 %vm90_vm1, %v53_v17 }
  0x17   :  { %2293 = vmatmul.mubr.msk.f32.gmra.mxu0 %vm90_vm1, %v22_v18  ;;  %2341 = vmatmul.mubr.msk.f32.gmra.mxu1 %vm90_vm1, %v54_v19 }
  0x18   :  { %8 = vsyncpa [#allocation3], 0  ;;  %2295 = vmatprep.mubr.msk.f32.mxu0 %vm90_vm1, %v23_v20  ;;  %2343 = vmatprep.mubr.msk.f32.mxu1 %vm90_vm1, %v55_v21  ;;  %v24_v22 = vld [vmem:[%s3519_s0 + $0x48] sm:$0xff]  ;;  %v25_v24 = vld [vmem:[%s3519_s0 + $0x50] sm:$0xff]  ;;  %vm928_vm2 = vcmask 257024   ;;  %vm1825_vm3 = vcmask 261120  }
  0x19   :  { %v56_v23 = vld [vmem:[%s3519_s0 + $0x148] sm:$0xff]  ;;  %v57_v25 = vld [vmem:[%s3519_s0 + $0x150] sm:$0xff]  ;;  %v26_v26 = vld [vmem:[%s3519_s0 + $0x58] sm:$0xff]  ;;  %vm2082_vm4 = vcmask 1041409   ;;  %vm2084_vm5 = vcmask 1042434   ;;  %vm2086_vm6 = vcmask 1043459  }
  0x1a   :  { %v58_v27 = vld [vmem:[%s3519_s0 + $0x158] sm:$0xff]  ;;  %v27_v28 = vld [vmem:[%s3519_s0 + $0x60] sm:$0xff]  ;;  %v28_v30 = vld [vmem:[%s3519_s0 + $0x68] sm:$0xff]  ;;  %vm2088_vm7 = vcmask 1044484   ;;  %vm2090_vm8 = vcmask 1045509   ;;  %vm2092_vm9 = vcmask 1046534  }
  0x1b   :  { %2296 = vmatmul.mubr.msk.f32.gmra.mxu0 %vm90_vm1, %v24_v22  ;;  %2344 = vmatmul.mubr.msk.f32.gmra.mxu1 %vm90_vm1, %v56_v23  ;;  %v59_v29 = vld [vmem:[%s3519_s0 + $0x160] sm:$0xff]  ;;  %v60_v31 = vld [vmem:[%s3519_s0 + $0x168] sm:$0xff]  ;;  %v29_v32 = vld [vmem:[%s3519_s0 + $0x70] sm:$0xff]  ;;  %vm2094_vm10 = vcmask 1047559  }
  0x1c   :  { %2298 = vmatprep.mubr.msk.f32.mxu0 %vm90_vm1, %v25_v24  ;;  %2346 = vmatprep.mubr.msk.f32.mxu1 %vm90_vm1, %v57_v25  ;;  %v61_v33 = vld [vmem:[%s3519_s0 + $0x170] sm:$0xff]  ;;  %v30_v34 = vld [vmem:[%s3519_s0 + $0x78] sm:$0xff]  ;;  %v31_v36 = vld [vmem:[%s3519_s0 + $0x80] sm:$0xff] }
  0x1d   :  { %v62_v35 = vld [vmem:[%s3519_s0 + $0x178] sm:$0xff]  ;;  %v63_v37 = vld [vmem:[%s3519_s0 + $0x180] sm:$0xff]  ;;  %v32_v38 = vld [vmem:[%s3519_s0 + $0x88] sm:$0xff] }
  0x1e   :  { %v64_v39 = vld [vmem:[%s3519_s0 + $0x188] sm:$0xff]  ;;  %v33_v40 = vld [vmem:[%s3519_s0 + $0x90] sm:$0xff]  ;;  %v34_v42 = vld [vmem:[%s3519_s0 + $0x98] sm:$0xff] }
  0x1f   :  { %2299 = vmatmul.mubr.msk.f32.gmra.mxu0 %vm90_vm1, %v26_v26  ;;  %2347 = vmatmul.mubr.msk.f32.gmra.mxu1 %vm90_vm1, %v58_v27  ;;  %v65_v41 = vld [vmem:[%s3519_s0 + $0x190] sm:$0xff]  ;;  %v66_v43 = vld [vmem:[%s3519_s0 + $0x198] sm:$0xff]  ;;  %v35_v44 = vld [vmem:[%s3519_s0 + $0xa0] sm:$0xff] }
  0x20   :  { %2301 = vmatprep.mubr.msk.f32.mxu0 %vm90_vm1, %v27_v28  ;;  %2349 = vmatprep.mubr.msk.f32.mxu1 %vm90_vm1, %v59_v29  ;;  %v67_v45 = vld [vmem:[%s3519_s0 + $0x1a0] sm:$0xff]  ;;  %v36_v46 = vld [vmem:[%s3519_s0 + $0xa8] sm:$0xff]  ;;  %v37_v48 = vld [vmem:[%s3519_s0 + $0xb0] sm:$0xff] }
  0x21   :  { %v68_v47 = vld [vmem:[%s3519_s0 + $0x1a8] sm:$0xff]  ;;  %v69_v49 = vld [vmem:[%s3519_s0 + $0x1b0] sm:$0xff]  ;;  %v38_v50 = vld [vmem:[%s3519_s0 + $0xb8] sm:$0xff] }
  0x22   :  { %v70_v51 = vld [vmem:[%s3519_s0 + $0x1b8] sm:$0xff]  ;;  %v39_v52 = vld [vmem:[%s3519_s0 + $0xc0] sm:$0xff]  ;;  %v40_v54 = vld [vmem:[%s3519_s0 + $0xc8] sm:$0xff] }
  0x23   :  { %2302 = vmatmul.mubr.msk.f32.gmra.mxu0 %vm90_vm1, %v28_v30  ;;  %2350 = vmatmul.mubr.msk.f32.gmra.mxu1 %vm90_vm1, %v60_v31  ;;  %v71_v53 = vld [vmem:[%s3519_s0 + $0x1c0] sm:$0xff]  ;;  %v72_v55 = vld [vmem:[%s3519_s0 + $0x1c8] sm:$0xff]  ;;  %v41_v56 = vld [vmem:[%s3519_s0 + $0xd0] sm:$0xff] }
  0x24   :  { %2304 = vmatprep.mubr.msk.f32.mxu0 %vm90_vm1, %v29_v32  ;;  %2352 = vmatprep.mubr.msk.f32.mxu1 %vm90_vm1, %v61_v33  ;;  %v73_v57 = vld [vmem:[%s3519_s0 + $0x1d0] sm:$0xff]  ;;  %v42_v58 = vld [vmem:[%s3519_s0 + $0xd8] sm:$0xff]  ;;  %v43_v60 = vld [vmem:[%s3519_s0 + $0xe0] sm:$0xff] }
  0x25   :  { %v74_v59 = vld [vmem:[%s3519_s0 + $0x1d8] sm:$0xff]  ;;  %v75_v61 = vld [vmem:[%s3519_s0 + $0x1e0] sm:$0xff]  ;;  %v44_v62 = vld [vmem:[%s3519_s0 + $0xe8] sm:$0xff] }
  0x26   :  { %v76_v63 = vld [vmem:[%s3519_s0 + $0x1e8] sm:$0xff]  ;;  %v45_v0 = vld [vmem:[%s3519_s0 + $0xf0] sm:$0xff]  ;;  %v46_v2 = vld [vmem:[%s3519_s0 + $0xf8] sm:$0xff] }
  0x27   :  { %2305 = vmatmul.mubr.msk.f32.gmra.mxu0 %vm90_vm1, %v30_v34  ;;  %2353 = vmatmul.mubr.msk.f32.gmra.mxu1 %vm90_vm1, %v62_v35  ;;  %v77_v1 = vld [vmem:[%s3519_s0 + $0x1f0] sm:$0xff]  ;;  %v78_v3 = vld [vmem:[%s3519_s0 + $0x1f8] sm:$0xff]  ;;  %v2708_v4 = vld [vmem:[%s3521_s2] ss:$0 sm:$0xff] }
  0x28   :  { %2307 = vmatprep.mubr.msk.f32.mxu0 %vm90_vm1, %v31_v36  ;;  %2355 = vmatprep.mubr.msk.f32.mxu1 %vm90_vm1, %v63_v37 }
  0x2b   :  { %2308 = vmatmul.mubr.msk.f32.gmra.mxu0 %vm90_vm1, %v32_v38  ;;  %2356 = vmatmul.mubr.msk.f32.gmra.mxu1 %vm90_vm1, %v64_v39 }
  0x2c   :  { %2310 = vmatprep.mubr.msk.f32.mxu0 %vm90_vm1, %v33_v40  ;;  %2358 = vmatprep.mubr.msk.f32.mxu1 %vm90_vm1, %v65_v41 }
  0x2f   :  { %2311 = vmatmul.mubr.msk.f32.gmra.mxu0 %vm90_vm1, %v34_v42  ;;  %2359 = vmatmul.mubr.msk.f32.gmra.mxu1 %vm90_vm1, %v66_v43 }
  0x30   :  { %2313 = vmatprep.mubr.msk.f32.mxu0 %vm90_vm1, %v35_v44  ;;  %2361 = vmatprep.mubr.msk.f32.mxu1 %vm90_vm1, %v67_v45 }
  0x33   :  { %2314 = vmatmul.mubr.msk.f32.gmra.mxu0 %vm90_vm1, %v36_v46  ;;  %2362 = vmatmul.mubr.msk.f32.gmra.mxu1 %vm90_vm1, %v68_v47 }
  0x34   :  { %2316 = vmatprep.mubr.msk.f32.mxu0 %vm90_vm1, %v37_v48  ;;  %2364 = vmatprep.mubr.msk.f32.mxu1 %vm90_vm1, %v69_v49 }
  0x37   :  { %2317 = vmatmul.mubr.msk.f32.gmra.mxu0 %vm90_vm1, %v38_v50  ;;  %2365 = vmatmul.mubr.msk.f32.gmra.mxu1 %vm90_vm1, %v70_v51 }
  0x38   :  { %2319 = vmatprep.mubr.msk.f32.mxu0 %vm90_vm1, %v39_v52  ;;  %2367 = vmatprep.mubr.msk.f32.mxu1 %vm90_vm1, %v71_v53 }
  0x3b   :  { %2320 = vmatmul.mubr.msk.f32.gmra.mxu0 %vm90_vm1, %v40_v54  ;;  %2368 = vmatmul.mubr.msk.f32.gmra.mxu1 %vm90_vm1, %v72_v55 }
  0x3c   :  { %2322 = vmatprep.mubr.msk.f32.mxu0 %vm90_vm1, %v41_v56  ;;  %2370 = vmatprep.mubr.msk.f32.mxu1 %vm90_vm1, %v73_v57 }
  0x3f   :  { %2323 = vmatmul.mubr.msk.f32.gmra.mxu0 %vm90_vm1, %v42_v58  ;;  %2371 = vmatmul.mubr.msk.f32.gmra.mxu1 %vm90_vm1, %v74_v59 }
  0x40   :  { %2325 = vmatprep.mubr.msk.f32.mxu0 %vm90_vm1, %v43_v60  ;;  %2373 = vmatprep.mubr.msk.f32.mxu1 %vm90_vm1, %v75_v61 }
  0x43   :  { %2326 = vmatmul.mubr.msk.f32.gmra.mxu0 %vm90_vm1, %v44_v62  ;;  %2374 = vmatmul.mubr.msk.f32.gmra.mxu1 %vm90_vm1, %v76_v63 }
  0x44   :  { %2328 = vmatprep.mubr.msk.f32.mxu0 %vm90_vm1, %v45_v0  ;;  %2376 = vmatprep.mubr.msk.f32.mxu1 %vm90_vm1, %v77_v1 }
  0x47   :  { %2329 = vmatmul.mubr.msk.f32.gmra.mxu0 %vm90_vm1, %v46_v2  ;;  %2377 = vmatmul.mubr.msk.f32.gmra.mxu1 %vm90_vm1, %v78_v3 }
  0xcb   :  { %v2285_v5 = vpop.f32.mrf.mxu0  ;;  %v2333_v6 = vpop.f32.mrf.mxu1 }
  0xcc   :  { %v359_v7 = vadd.f32 %v2285_v5, %v2708_v4  ;;  %v519_v8 = vadd.f32 %v2333_v6, %v2708_v4 }
  0xcd   :  { %v353_v9 = vpop.f32.mrf.mxu0  ;;  %v513_v10 = vpop.f32.mrf.mxu1 }
  0xce   :  { %v673_v11 = vmax.f32 %v359_v7, 0.0  ;;  %v705_v12 = vmax.f32 %v519_v8, 0.0  ;;  %v354_v13 = vadd.f32 %v2708_v4, %v353_v9  ;;  %v514_v14 = vadd.f32 %v2708_v4, %v513_v10 }
  0xcf   :  { %v2288_v39 = vpop.f32.mrf.mxu0  ;;  %v2336_v40 = vpop.f32.mrf.mxu1 }
  0xd0   :  { %v801_v15 = vcombine.high %v673_v11, %v673_v11  ;;  %v943_v16 = vsel %vm928_vm2, %v673_v11, -inf  ;;  %v833_v17 = vcombine.high %v705_v12, %v705_v12  ;;  %v1391_v18 = vsel %vm928_vm2, %v705_v12, -inf }
  0xd1   :  { %v944_v19 = vrot.slane %v943_v16, 4  ;;  %v1392_v20 = vrot.slane %v1391_v18, 4  ;;  %v672_v21 = vmax.f32 %v354_v13, 0.0  ;;  %v704_v22 = vmax.f32 %v514_v14, 0.0  ;;  %v363_v8 = vpop.f32.mrf.mxu0  ;;  %v523_v9 = vpop.f32.mrf.mxu1 }
  0xd2   :  { %v950_v23 = vsel %vm928_vm2, %v801_v15, -inf  ;;  %v1398_v24 = vsel %vm928_vm2, %v833_v17, -inf  ;;  %v369_v47 = vadd.f32 %v2288_v39, %v2708_v4  ;;  %v529_v48 = vadd.f32 %v2336_v40, %v2708_v4 }
  0xd3   :  { %v945_v25 = vmax.f32 %v943_v16, %v944_v19  ;;  %v951_v26 = vrot.slane %v950_v23, 4  ;;  %v1393_v27 = vmax.f32 %v1391_v18, %v1392_v20  ;;  %v1399_v28 = vrot.slane %v1398_v24, 4 }
  0xd4   :  { %v800_v29 = vcombine.high %v672_v21, %v672_v21  ;;  %v929_v30 = vsel %vm928_vm2, %v672_v21, -inf  ;;  %v832_v31 = vcombine.high %v704_v22, %v704_v22  ;;  %v1377_v32 = vsel %vm928_vm2, %v704_v22, -inf }
  0xd5   :  { %v946_v33 = vrot.slane %v945_v25, 2  ;;  %v952_v34 = vmax.f32 %v950_v23, %v951_v26  ;;  %v1394_v35 = vrot.slane %v1393_v27, 2  ;;  %v1400_v36 = vmax.f32 %v1398_v24, %v1399_v28 }
  0xd6   :  { %v930_v37 = vrot.slane %v929_v30, 4  ;;  %v1378_v38 = vrot.slane %v1377_v32, 4  ;;  %v936_v41 = vsel %vm928_vm2, %v800_v29, -inf  ;;  %v1384_v42 = vsel %vm928_vm2, %v832_v31, -inf }
  0xd7   :  { %v947_v43 = vmax.f32 %v945_v25, %v946_v33  ;;  %v953_v44 = vrot.slane %v952_v34, 2  ;;  %v1395_v45 = vmax.f32 %v1393_v27, %v1394_v35  ;;  %v1401_v46 = vrot.slane %v1400_v36, 2  ;;  %v2339_v35 = vpop.f32.mrf.mxu1 }
  0xd8   :  { %v931_v49 = vmax.f32 %v929_v30, %v930_v37  ;;  %v937_v50 = vrot.slane %v936_v41, 4  ;;  %v1379_v51 = vmax.f32 %v1377_v32, %v1378_v38  ;;  %v1385_v52 = vrot.slane %v1384_v42, 4  ;;  %v2291_v30 = vpop.f32.mrf.mxu0 }
  0xd9   :  { %v948_v53 = vrot.slane %v947_v43, 1  ;;  %v954_v54 = vmax.f32 %v952_v34, %v953_v44  ;;  %v1396_v55 = vrot.slane %v1395_v45, 1  ;;  %v1402_v56 = vmax.f32 %v1400_v36, %v1401_v46 }
  0xda   :  { %v675_v57 = vmax.f32 %v369_v47, 0.0  ;;  %v707_v58 = vmax.f32 %v529_v48, 0.0  ;;  %v932_v59 = vrot.slane %v931_v49, 2  ;;  %v938_v60 = vmax.f32 %v936_v41, %v937_v50 }
  0xdb   :  { %v1380_v61 = vrot.slane %v1379_v51, 2  ;;  %v1386_v62 = vmax.f32 %v1384_v42, %v1385_v52  ;;  %v949_v3 = vmax.f32 %v947_v43, %v948_v53  ;;  %v955_v5 = vrot.slane %v954_v54, 1 }
  0xdc   :  { %v803_v63 = vcombine.high %v675_v57, %v675_v57  ;;  %v971_v0 = vsel %vm928_vm2, %v675_v57, -inf  ;;  %v835_v1 = vcombine.high %v707_v58, %v707_v58  ;;  %v1419_v2 = vsel %vm928_vm2, %v707_v58, -inf }
  0xdd   :  { %v1397_v6 = vmax.f32 %v1395_v45, %v1396_v55  ;;  %v1403_v7 = vrot.slane %v1402_v56, 1  ;;  %v972_v10 = vrot.slane %v971_v0, 4  ;;  %v1420_v12 = vrot.slane %v1419_v2, 4 }
  0xde   :  { %v978_v11 = vsel %vm928_vm2, %v803_v63, -inf  ;;  %v1426_v13 = vsel %vm928_vm2, %v835_v1, -inf  ;;  %v933_v14 = vmax.f32 %v931_v49, %v932_v59  ;;  %v939_v15 = vrot.slane %v938_v60, 2 }
  0xdf   :  { %v979_v16 = vrot.slane %v978_v11, 4  ;;  %v1427_v17 = vrot.slane %v1426_v13, 4  ;;  %v973_v18 = vmax.f32 %v971_v0, %v972_v10  ;;  %v1421_v19 = vmax.f32 %v1419_v2, %v1420_v12 }
  0xe0   :  { %v364_v20 = vadd.f32 %v2708_v4, %v363_v8  ;;  %v524_v21 = vadd.f32 %v2708_v4, %v523_v9  ;;  %v1381_v22 = vmax.f32 %v1379_v51, %v1380_v61  ;;  %v1387_v23 = vrot.slane %v1386_v62, 2 }
  0xe1   :  { %v980_v24 = vmax.f32 %v978_v11, %v979_v16  ;;  %v1428_v25 = vmax.f32 %v1426_v13, %v1427_v17  ;;  %v956_v26 = vmax.f32 %v954_v54, %v955_v5  ;;  %v2731_v27 = vsel %vm1825_vm3, %v949_v3, -inf }
  0xe2   :  { %v674_v28 = vmax.f32 %v364_v20, 0.0  ;;  %v706_v29 = vmax.f32 %v524_v21, 0.0  ;;  %v1404_v31 = vmax.f32 %v1402_v56, %v1403_v7  ;;  %v2734_v32 = vsel %vm1825_vm3, %v1397_v6, -inf }
  0xe3   :  { %v934_v33 = vrot.slane %v933_v14, 1  ;;  %v974_v34 = vrot.slane %v973_v18, 2  ;;  %v981_v36 = vrot.slane %v980_v24, 2  ;;  %v1422_v37 = vrot.slane %v1421_v19, 2 }
  0xe4   :  { %v802_v38 = vcombine.high %v674_v28, %v674_v28  ;;  %v957_v39 = vsel %vm928_vm2, %v674_v28, -inf  ;;  %v940_v40 = vmax.f32 %v938_v60, %v939_v15  ;;  %v1429_v41 = vrot.slane %v1428_v25, 2 }
  0xe5   :  { %v958_v42 = vrot.slane %v957_v39, 4  ;;  %v379_v43 = vadd.f32 %v2291_v30, %v2708_v4  ;;  %v834_v45 = vcombine.high %v706_v29, %v706_v29  ;;  %v1405_v46 = vsel %vm928_vm2, %v706_v29, -inf }
  0xe6   :  { %v964_v44 = vsel %vm928_vm2, %v802_v38, -inf  ;;  %v539_v47 = vadd.f32 %v2339_v35, %v2708_v4  ;;  %v1382_v48 = vrot.slane %v1381_v22, 1  ;;  %v1388_v49 = vmax.f32 %v1386_v62, %v1387_v23 }
  0xe7   :  { %v959_v50 = vmax.f32 %v957_v39, %v958_v42  ;;  %v965_v51 = vrot.slane %v964_v44, 4  ;;  %v975_v52 = vmax.f32 %v973_v18, %v974_v34  ;;  %v982_v53 = vmax.f32 %v980_v24, %v981_v36 }
  0xe8   :  { %v1423_v54 = vmax.f32 %v1421_v19, %v1422_v37  ;;  %v1406_v55 = vrot.slane %v1405_v46, 4  ;;  %v2742_v56 = vsel %vm1825_vm3, %v956_v26, -inf  ;;  %v2745_v57 = vsel %vm1825_vm3, %v1404_v31, -inf }
  0xe9   :  { %v1430_v58 = vmax.f32 %v1428_v25, %v1429_v41  ;;  %v677_v59 = vmax.f32 %v379_v43, 0.0  ;;  %v960_v60 = vrot.slane %v959_v50, 2  ;;  %v966_v61 = vmax.f32 %v964_v44, %v965_v51  ;;  %v373_v43 = vpop.f32.mrf.mxu0  ;;  %v533_v44 = vpop.f32.mrf.mxu1 }
  0xea   :  { %v1412_v63 = vsel %vm928_vm2, %v834_v45, -inf  ;;  %v709_v0 = vmax.f32 %v539_v47, 0.0  ;;  %v935_v62 = vmax.f32 %v933_v14, %v934_v33  ;;  %v941_v1 = vrot.slane %v940_v40, 1 }
  0xeb   :  { %v1383_v2 = vmax.f32 %v1381_v22, %v1382_v48  ;;  %v1389_v3 = vrot.slane %v1388_v49, 1  ;;  %v976_v5 = vrot.slane %v975_v52, 1  ;;  %v983_v6 = vrot.slane %v982_v53, 1 }
  0xec   :  { %v1424_v7 = vrot.slane %v1423_v54, 1  ;;  %v1407_v8 = vmax.f32 %v1405_v46, %v1406_v55  ;;  %v1431_v9 = vrot.slane %v1430_v58, 1  ;;  %v1413_v10 = vrot.slane %v1412_v63, 4 }
  0xed   :  { %v805_v11 = vcombine.high %v677_v59, %v677_v59  ;;  %v999_v12 = vsel %vm928_vm2, %v677_v59, -inf  ;;  %v961_v13 = vmax.f32 %v959_v50, %v960_v60  ;;  %v967_v15 = vrot.slane %v966_v61, 2 }
  0xee   :  { %v1000_v16 = vrot.slane %v999_v12, 4  ;;  %v837_v17 = vcombine.high %v709_v0, %v709_v0  ;;  %v942_v18 = vmax.f32 %v940_v40, %v941_v1  ;;  %v1390_v19 = vmax.f32 %v1388_v49, %v1389_v3 }
  0xef   :  { %v1006_v14 = vsel %vm928_vm2, %v805_v11, -inf  ;;  %v1447_v20 = vsel %vm928_vm2, %v709_v0, -inf  ;;  %v977_v21 = vmax.f32 %v975_v52, %v976_v5  ;;  %v984_v22 = vmax.f32 %v982_v53, %v983_v6  ;;  %v2294_v0 = vpop.f32.mrf.mxu0 }
  0xf0   :  { %v1425_v23 = vmax.f32 %v1423_v54, %v1424_v7  ;;  %v1408_v24 = vrot.slane %v1407_v8, 2  ;;  %v1432_v25 = vmax.f32 %v1430_v58, %v1431_v9  ;;  %v1414_v26 = vmax.f32 %v1412_v63, %v1413_v10 }
  0xf1   :  { %v1007_v28 = vrot.slane %v1006_v14, 4  ;;  %v1454_v29 = vsel %vm928_vm2, %v837_v17, -inf  ;;  %v962_v30 = vrot.slane %v961_v13, 1  ;;  %v968_v31 = vmax.f32 %v966_v61, %v967_v15 }
  0xf2   :  { %v1001_v33 = vmax.f32 %v999_v12, %v1000_v16  ;;  %v1448_v34 = vrot.slane %v1447_v20, 4  ;;  %v2753_v35 = vsel %vm1825_vm3, %v935_v62, -inf  ;;  %v2756_v36 = vsel %vm1825_vm3, %v942_v18, -inf  ;;  %v2342_v62 = vpop.f32.mrf.mxu1 }
  0xf3   :  { %v2759_v37 = vsel %vm1825_vm3, %v1383_v2, -inf  ;;  %v2762_v38 = vsel %vm1825_vm3, %v1390_v19, -inf  ;;  %v2765_v39 = vsel %vm1825_vm3, %v977_v21, -inf  ;;  %v2768_v40 = vsel %vm1825_vm3, %v1425_v23, -inf }
  0xf4   :  { %v1409_v41 = vmax.f32 %v1407_v8, %v1408_v24  ;;  %v1455_v42 = vrot.slane %v1454_v29, 4  ;;  %v2771_v45 = vsel %vm1825_vm3, %v984_v22, -inf  ;;  %v2774_v46 = vsel %vm1825_vm3, %v1432_v25, -inf }
  0xf5   :  { %v1415_v47 = vrot.slane %v1414_v26, 2  ;;  %v1008_v48 = vmax.f32 %v1006_v14, %v1007_v28  ;;  %v963_v49 = vmax.f32 %v961_v13, %v962_v30  ;;  %v969_v50 = vrot.slane %v968_v31, 1 }
  0xf6   :  { %v1002_v51 = vrot.slane %v1001_v33, 2  ;;  %v1449_v52 = vmax.f32 %v1447_v20, %v1448_v34  ;;  %v1842_v53 = vmax.f32 %v2731_v27, %v2765_v39  ;;  %v1954_v54 = vmax.f32 %v2734_v32, %v2768_v40 }
  0xf7   :  { %v374_v55 = vadd.f32 %v2708_v4, %v373_v43  ;;  %v534_v58 = vadd.f32 %v2708_v4, %v533_v44  ;;  %v1849_v59 = vmax.f32 %v2742_v56, %v2771_v45  ;;  %v1961_v60 = vmax.f32 %v2745_v57, %v2774_v46 }
  0xf8   :  { %v1410_v61 = vrot.slane %v1409_v41, 1  ;;  %v1456_v63 = vmax.f32 %v1454_v29, %v1455_v42  ;;  %v1416_v1 = vmax.f32 %v1414_v26, %v1415_v47  ;;  %v1009_v2 = vrot.slane %v1008_v48, 2 }
  0xf9   :  { %v676_v3 = vmax.f32 %v374_v55, 0.0  ;;  %v708_v5 = vmax.f32 %v534_v58, 0.0  ;;  %v970_v6 = vmax.f32 %v968_v31, %v969_v50  ;;  %v2787_v7 = vsel %vm1825_vm3, %v963_v49, -inf }
  0xfa   :  { %v1003_v8 = vmax.f32 %v1001_v33, %v1002_v51  ;;  %v1450_v9 = vrot.slane %v1449_v52, 2  ;;  %v389_v12 = vadd.f32 %v2294_v0, %v2708_v4  ;;  %v549_v13 = vadd.f32 %v2342_v62, %v2708_v4 }
  0xfb   :  { %v804_v10 = vcombine.high %v676_v3, %v676_v3  ;;  %v985_v11 = vsel %vm928_vm2, %v676_v3, -inf  ;;  %v1411_v15 = vmax.f32 %v1409_v41, %v1410_v61  ;;  %v1457_v16 = vrot.slane %v1456_v63, 2 }
  0xfc   :  { %v986_v17 = vrot.slane %v985_v11, 4  ;;  %v836_v18 = vcombine.high %v708_v5, %v708_v5  ;;  %v1417_v19 = vrot.slane %v1416_v1, 1  ;;  %v1010_v14 = vmax.f32 %v1008_v48, %v1009_v2 }
  0xfd   :  { %v992_v20 = vsel %vm928_vm2, %v804_v10, -inf  ;;  %v1433_v21 = vsel %vm928_vm2, %v708_v5, -inf  ;;  %v1004_v22 = vrot.slane %v1003_v8, 1  ;;  %v1451_v23 = vmax.f32 %v1449_v52, %v1450_v9 }
  0xfe   :  { %v987_v24 = vmax.f32 %v985_v11, %v986_v17  ;;  %v993_v25 = vrot.slane %v992_v20, 4  ;;  %v1434_v26 = vrot.slane %v1433_v21, 4  ;;  %v1440_v28 = vsel %vm928_vm2, %v836_v18, -inf }
  0xff   :  { %v679_v29 = vmax.f32 %v389_v12, 0.0  ;;  %v711_v30 = vmax.f32 %v549_v13, 0.0  ;;  %v1458_v31 = vmax.f32 %v1456_v63, %v1457_v16  ;;  %v1441_v41 = vrot.slane %v1440_v28, 4 }
 0x100   :  { %v988_v33 = vrot.slane %v987_v24, 2  ;;  %v994_v34 = vmax.f32 %v992_v20, %v993_v25  ;;  %v1418_v42 = vmax.f32 %v1416_v1, %v1417_v19  ;;  %v1011_v43 = vrot.slane %v1010_v14, 1 }
 0x101   :  { %v807_v44 = vcombine.high %v679_v29, %v679_v29  ;;  %v1027_v47 = vsel %vm928_vm2, %v679_v29, -inf  ;;  %v1452_v48 = vrot.slane %v1451_v23, 1  ;;  %v1435_v50 = vmax.f32 %v1433_v21, %v1434_v26 }
 0x102   :  { %v989_v49 = vmax.f32 %v987_v24, %v988_v33  ;;  %v1028_v51 = vrot.slane %v1027_v47, 4  ;;  %v995_v52 = vrot.slane %v994_v34, 2  ;;  %v839_v58 = vcombine.high %v711_v30, %v711_v30  ;;  %v543_v33 = vpop.f32.mrf.mxu1 }
 0x103   :  { %v1034_v55 = vsel %vm928_vm2, %v807_v44, -inf  ;;  %v1475_v61 = vsel %vm928_vm2, %v711_v30, -inf  ;;  %v1828_v63 = vmax.f32 %v2753_v35, %v2787_v7  ;;  %v1005_v0 = vmax.f32 %v1003_v8, %v1004_v22  ;;  %v383_v8 = vpop.f32.mrf.mxu0 }
 0x104   :  { %v1459_v62 = vrot.slane %v1458_v31, 1  ;;  %v1442_v1 = vmax.f32 %v1440_v28, %v1441_v41  ;;  %v1012_v2 = vmax.f32 %v1010_v14, %v1011_v43  ;;  %v990_v3 = vrot.slane %v989_v49, 1 }
 0x105   :  { %v1035_v5 = vrot.slane %v1034_v55, 4  ;;  %v1476_v9 = vrot.slane %v1475_v61, 4  ;;  %v2801_v10 = vsel %vm1825_vm3, %v970_v6, -inf  ;;  %v2804_v11 = vsel %vm1825_vm3, %v1411_v15, -inf }
 0x106   :  { %v1453_v12 = vmax.f32 %v1451_v23, %v1452_v48  ;;  %v1029_v13 = vmax.f32 %v1027_v47, %v1028_v51  ;;  %v2807_v16 = vsel %vm1825_vm3, %v1418_v42, -inf  ;;  %v996_v17 = vmax.f32 %v994_v34, %v995_v52  ;;  %v2297_v34 = vpop.f32.mrf.mxu0 }
 0x107   :  { %v1436_v35 = vrot.slane %v1435_v50, 2  ;;  %v1482_v7 = vsel %vm928_vm2, %v839_v58, -inf  ;;  %v1843_v18 = vsel %vm1825_vm3, %v1005_v0, -inf  ;;  %v1460_v19 = vmax.f32 %v1458_v31, %v1459_v62 }
 0x108   :  { %v1443_v14 = vrot.slane %v1442_v1, 2  ;;  %v1036_v20 = vmax.f32 %v1034_v55, %v1035_v5  ;;  %v1835_v6 = vmax.f32 %v2756_v36, %v2801_v10  ;;  %v1850_v15 = vsel %vm1825_vm3, %v1012_v2, -inf }
 0x109   :  { %v991_v21 = vmax.f32 %v989_v49, %v990_v3  ;;  %v1477_v22 = vmax.f32 %v1475_v61, %v1476_v9  ;;  %v1940_v23 = vmax.f32 %v2759_v37, %v2804_v11  ;;  %v1955_v24 = vsel %vm1825_vm3, %v1453_v12, -inf }
 0x10a   :  { %v1030_v25 = vrot.slane %v1029_v13, 2  ;;  %v1483_v26 = vrot.slane %v1482_v7, 4  ;;  %v1947_v28 = vmax.f32 %v2762_v38, %v2807_v16  ;;  %v2822_v29 = vmax.f32 %v1842_v53, %v1843_v18 }
 0x10b   :  { %v997_v30 = vrot.slane %v996_v17, 1  ;;  %v1437_v31 = vmax.f32 %v1435_v50, %v1436_v35  ;;  %v2827_v41 = vmax.f32 %v1849_v59, %v1850_v15  ;;  %v1962_v42 = vsel %vm1825_vm3, %v1460_v19, -inf }
 0x10c   :  { %v1444_v43 = vmax.f32 %v1442_v1, %v1443_v14  ;;  %v1037_v44 = vrot.slane %v1036_v20, 2  ;;  %v2833_v47 = vmax.f32 %v1954_v54, %v1955_v24  ;;  %v1829_v27 = vsel %vm1825_vm3, %v991_v21, -inf  ;;  %v2345_v54 = vpop.f32.mrf.mxu1 }
 0x10d   :  { %v1478_v39 = vrot.slane %v1477_v22, 2  ;;  %v384_v53 = vadd.f32 %v2708_v4, %v383_v8  ;;  %v1031_v48 = vmax.f32 %v1029_v13, %v1030_v25  ;;  %v1484_v49 = vmax.f32 %v1482_v7, %v1483_v26 }
 0x10e   :  { %v544_v56 = vadd.f32 %v2708_v4, %v543_v33  ;;  %v399_v45 = vadd.f32 %v2297_v34, %v2708_v4  ;;  %v2842_v59 = vmax.f32 %v1961_v60, %v1962_v42  ;;  %v998_v50 = vmax.f32 %v996_v17, %v997_v30 }
 0x10f   :  { %v1438_v32 = vrot.slane %v1437_v31, 1  ;;  %v678_v40 = vmax.f32 %v384_v53, 0.0  ;;  %v1445_v51 = vrot.slane %v1444_v43, 1  ;;  %v1038_v52 = vmax.f32 %v1036_v20, %v1037_v44 }
 0x110   :  { %v710_v55 = vmax.f32 %v544_v56, 0.0  ;;  %v681_v58 = vmax.f32 %v399_v45, 0.0  ;;  %v2844_v61 = vmax.f32 %v1828_v63, %v1829_v27  ;;  %v1479_v0 = vmax.f32 %v1477_v22, %v1478_v39 }
 0x111   :  { %v806_v62 = vcombine.high %v678_v40, %v678_v40  ;;  %v1013_v1 = vsel %vm928_vm2, %v678_v40, -inf  ;;  %v1032_v2 = vrot.slane %v1031_v48, 1  ;;  %v1485_v3 = vrot.slane %v1484_v49, 2 }
 0x112   :  { %v1014_v5 = vrot.slane %v1013_v1, 4  ;;  %v559_v57 = vadd.f32 %v2345_v54, %v2708_v4  ;;  %v838_v60 = vcombine.high %v710_v55, %v710_v55  ;;  %v1461_v9 = vsel %vm928_vm2, %v710_v55, -inf }
 0x113   :  { %v1020_v46 = vsel %vm928_vm2, %v806_v62, -inf  ;;  %v809_v12 = vcombine.high %v681_v58, %v681_v58  ;;  %v1039_v13 = vrot.slane %v1038_v52, 1  ;;  %v1462_v63 = vrot.slane %v1461_v9, 4 }
 0x114   :  { %v1015_v17 = vmax.f32 %v1013_v1, %v1014_v5  ;;  %v1021_v35 = vrot.slane %v1020_v46, 4  ;;  %v1480_v7 = vrot.slane %v1479_v0, 1  ;;  %v1468_v8 = vsel %vm928_vm2, %v838_v60, -inf  ;;  %v393_v1 = vpop.f32.mrf.mxu0 }
 0x115   :  { %v1055_v18 = vsel %vm928_vm2, %v681_v58, -inf  ;;  %v1062_v19 = vsel %vm928_vm2, %v809_v12, -inf  ;;  %v1463_v15 = vmax.f32 %v1461_v9, %v1462_v63  ;;  %v1469_v21 = vrot.slane %v1468_v8, 4 }
 0x116   :  { %v1016_v14 = vrot.slane %v1015_v17, 2  ;;  %v1022_v20 = vmax.f32 %v1020_v46, %v1021_v35  ;;  %v1486_v22 = vmax.f32 %v1484_v49, %v1485_v3  ;;  %v1056_v24 = vrot.slane %v1055_v18, 4 }
 0x117   :  { %v1063_v25 = vrot.slane %v1062_v19, 4  ;;  %v713_v26 = vmax.f32 %v559_v57, 0.0  ;;  %v1464_v34 = vrot.slane %v1463_v15, 2  ;;  %v1470_v42 = vmax.f32 %v1468_v8, %v1469_v21 }
 0x118   :  { %v1017_v30 = vmax.f32 %v1015_v17, %v1016_v14  ;;  %v1023_v33 = vrot.slane %v1022_v20, 2  ;;  %v1439_v44 = vmax.f32 %v1437_v31, %v1438_v32  ;;  %v1446_v27 = vmax.f32 %v1444_v43, %v1445_v51 }
 0x119   :  { %v1033_v39 = vmax.f32 %v1031_v48, %v1032_v2  ;;  %v841_v53 = vcombine.high %v713_v26, %v713_v26  ;;  %v1836_v56 = vsel %vm1825_vm3, %v998_v50, -inf  ;;  %v1471_v40 = vrot.slane %v1470_v42, 2 }
 0x11a   :  { %v1018_v45 = vrot.slane %v1017_v30, 1  ;;  %v1503_v54 = vsel %vm928_vm2, %v713_v26, -inf  ;;  %v1040_v55 = vmax.f32 %v1038_v52, %v1039_v13  ;;  %v1487_v58 = vrot.slane %v1486_v22, 1 }
 0x11b   :  { %v1057_v49 = vmax.f32 %v1055_v18, %v1056_v24  ;;  %v1510_v62 = vsel %vm928_vm2, %v841_v53, -inf  ;;  %v1481_v3 = vmax.f32 %v1479_v0, %v1480_v7  ;;  %v1024_v5 = vmax.f32 %v1022_v20, %v1023_v33  ;;  %v553_v7 = vpop.f32.mrf.mxu1 }
 0x11c   :  { %v1465_v57 = vmax.f32 %v1463_v15, %v1464_v34  ;;  %v1064_v46 = vmax.f32 %v1062_v19, %v1063_v25  ;;  %v1941_v31 = vsel %vm1825_vm3, %v1439_v44, -inf  ;;  %v1948_v43 = vsel %vm1825_vm3, %v1446_v27, -inf  ;;  %v2300_v15 = vpop.f32.mrf.mxu0 }
 0x11d   :  { %v2859_v48 = vsel %vm1825_vm3, %v1033_v39, -inf  ;;  %v1504_v50 = vrot.slane %v1503_v54, 4  ;;  %v1019_v32 = vmax.f32 %v1017_v30, %v1018_v45  ;;  %v1472_v51 = vmax.f32 %v1470_v42, %v1471_v40  ;;  %v2348_v24 = vpop.f32.mrf.mxu1 }
 0x11e   :  { %v1511_v52 = vrot.slane %v1510_v62, 4  ;;  %v394_v2 = vadd.f32 %v2708_v4, %v393_v1  ;;  %v2865_v0 = vmax.f32 %v1835_v6, %v1836_v56  ;;  %v2868_v60 = vsel %vm1825_vm3, %v1040_v55, -inf }
 0x11f   :  { %v1488_v9 = vmax.f32 %v1486_v22, %v1487_v58  ;;  %v1058_v12 = vrot.slane %v1057_v49, 2  ;;  %v2871_v13 = vsel %vm1825_vm3, %v1481_v3, -inf  ;;  %v1025_v17 = vrot.slane %v1024_v5, 1 }
 0x120   :  { %v1466_v35 = vrot.slane %v1465_v57, 1  ;;  %v1065_v63 = vrot.slane %v1064_v46, 2  ;;  %v2876_v8 = vmax.f32 %v1940_v23, %v1941_v31  ;;  %v2881_v36 = vmax.f32 %v1947_v28, %v1948_v43 }
 0x121   :  { %v1846_v10 = vmax.f32 %v2822_v29, %v2859_v48  ;;  %v1505_v6 = vmax.f32 %v1503_v54, %v1504_v50  ;;  %v2886_v18 = vsel %vm1825_vm3, %v1019_v32, -inf  ;;  %v1473_v19 = vrot.slane %v1472_v51, 1 }
 0x122   :  { %v1512_v14 = vmax.f32 %v1510_v62, %v1511_v52  ;;  %v680_v20 = vmax.f32 %v394_v2, 0.0  ;;  %v1958_v11 = vmax.f32 %v2833_v47, %v2871_v13  ;;  %v2893_v38 = vsel %vm1825_vm3, %v1488_v9, -inf }
 0x123   :  { %v1059_v16 = vmax.f32 %v1057_v49, %v1058_v12  ;;  %v1026_v23 = vmax.f32 %v1024_v5, %v1025_v17  ;;  %v1467_v28 = vmax.f32 %v1465_v57, %v1466_v35  ;;  %v1066_v21 = vmax.f32 %v1064_v46, %v1065_v63 }
 0x124   :  { %v808_v22 = vcombine.high %v680_v20, %v680_v20  ;;  %v1832_v25 = vmax.f32 %v2844_v61, %v2886_v18  ;;  %v1041_v26 = vsel %vm928_vm2, %v680_v20, -inf  ;;  %v554_v30 = vadd.f32 %v2708_v4, %v553_v7 }
 0x125   :  { %v409_v33 = vadd.f32 %v2300_v15, %v2708_v4  ;;  %v1474_v34 = vmax.f32 %v1472_v51, %v1473_v19  ;;  %v1506_v42 = vrot.slane %v1505_v6, 2  ;;  %v1513_v44 = vrot.slane %v1512_v14, 2 }
 0x126   :  { %v1042_v27 = vrot.slane %v1041_v26, 4  ;;  %v1048_v39 = vsel %vm928_vm2, %v808_v22, -inf  ;;  %v712_v53 = vmax.f32 %v554_v30, 0.0  ;;  %v569_v45 = vadd.f32 %v2348_v24, %v2708_v4 }
 0x127   :  { %v683_v56 = vmax.f32 %v409_v33, 0.0  ;;  %v1060_v40 = vrot.slane %v1059_v16, 1  ;;  %v1067_v54 = vrot.slane %v1066_v21, 1  ;;  %v1049_v55 = vrot.slane %v1048_v39, 4 }
 0x128   :  { %v1043_v61 = vmax.f32 %v1041_v26, %v1042_v27  ;;  %v840_v58 = vcombine.high %v712_v53, %v712_v53  ;;  %v1489_v49 = vsel %vm928_vm2, %v712_v53, -inf  ;;  %v1838_v3 = vsel %vm1825_vm3, %v1026_v23, -inf }
 0x129   :  { %v811_v62 = vcombine.high %v683_v56, %v683_v56  ;;  %v1083_v1 = vsel %vm928_vm2, %v683_v56, -inf  ;;  %v1950_v5 = vsel %vm1825_vm3, %v1474_v34, -inf  ;;  %v1507_v57 = vmax.f32 %v1505_v6, %v1506_v42  ;;  %v563_v56 = vpop.f32.mrf.mxu1 }
 0x12a   :  { %v1050_v46 = vmax.f32 %v1048_v39, %v1049_v55  ;;  %v1514_v31 = vmax.f32 %v1512_v14, %v1513_v44  ;;  %v1490_v43 = vrot.slane %v1489_v49, 4  ;;  %v1496_v50 = vsel %vm928_vm2, %v840_v58, -inf }
 0x12b   :  { %v715_v32 = vmax.f32 %v569_v45, 0.0  ;;  %v1943_v51 = vsel %vm1825_vm3, %v1467_v28, -inf  ;;  %v1044_v52 = vrot.slane %v1043_v61, 2  ;;  %v1084_v2 = vrot.slane %v1083_v1, 4 }
 0x12c   :  { %v1090_v9 = vsel %vm928_vm2, %v811_v62, -inf  ;;  %v1839_v12 = vmax.f32 %v2865_v0, %v1838_v3  ;;  %v1051_v17 = vrot.slane %v1050_v46, 2  ;;  %v1497_v35 = vrot.slane %v1496_v50, 4 }
 0x12d   :  { %v843_v63 = vcombine.high %v715_v32, %v715_v32  ;;  %v1951_v7 = vmax.f32 %v2881_v36, %v1950_v5  ;;  %v1061_v6 = vmax.f32 %v1059_v16, %v1060_v40  ;;  %v1508_v18 = vrot.slane %v1507_v57, 1  ;;  %v403_v16 = vpop.f32.mrf.mxu0 }
 0x12e   :  { %v1531_v19 = vsel %vm928_vm2, %v715_v32, -inf  ;;  %v1515_v14 = vrot.slane %v1514_v31, 1  ;;  %v1491_v20 = vmax.f32 %v1489_v49, %v1490_v43  ;;  %v1091_v15 = vrot.slane %v1090_v9, 4 }
 0x12f   :  { %v1538_v23 = vsel %vm928_vm2, %v843_v63, -inf  ;;  %v1944_v28 = vmax.f32 %v2876_v8, %v1943_v51  ;;  %v1068_v22 = vmax.f32 %v1066_v21, %v1067_v54  ;;  %v1045_v24 = vmax.f32 %v1043_v61, %v1044_v52 }
 0x130   :  { %v1085_v26 = vmax.f32 %v1083_v1, %v1084_v2  ;;  %v1052_v30 = vmax.f32 %v1050_v46, %v1051_v17  ;;  %v1498_v33 = vmax.f32 %v1496_v50, %v1497_v35  ;;  %v1532_v36 = vrot.slane %v1531_v19, 4  ;;  %v2303_v46 = vpop.f32.mrf.mxu0 }
 0x131   :  { %v2083_v34 = vsel %vm2082_vm4, %v1839_v12, %v1832_v25  ;;  %v2103_v42 = vsel %vm2082_vm4, %v1951_v7, %v1944_v28  ;;  %v2919_v44 = vsel %vm1825_vm3, %v1061_v6, -inf  ;;  %v1539_v27 = vrot.slane %v1538_v23, 4 }
 0x132   :  { %v1509_v39 = vmax.f32 %v1507_v57, %v1508_v18  ;;  %v1516_v8 = vmax.f32 %v1514_v31, %v1515_v14  ;;  %v1492_v21 = vrot.slane %v1491_v20, 2  ;;  %v1092_v53 = vmax.f32 %v1090_v9, %v1091_v15 }
 0x133   :  { %v2922_v45 = vsel %vm1825_vm3, %v1068_v22, -inf  ;;  %v1046_v40 = vrot.slane %v1045_v24, 1  ;;  %v1086_v54 = vrot.slane %v1085_v26, 2  ;;  %v404_v61 = vadd.f32 %v2708_v4, %v403_v16  ;;  %v2351_v22 = vpop.f32.mrf.mxu1 }
 0x134   :  { %v2929_v25 = vsel %vm2084_vm5, %v1846_v10, %v2083_v34  ;;  %v1053_v55 = vrot.slane %v1052_v30, 1  ;;  %v1499_v58 = vrot.slane %v1498_v33, 2  ;;  %v1533_v49 = vmax.f32 %v1531_v19, %v1532_v36  ;;  %v413_v36 = vpop.f32.mrf.mxu0 }
 0x135   :  { %v2935_v62 = vsel %vm2084_vm5, %v1958_v11, %v2103_v42  ;;  %v1540_v1 = vmax.f32 %v1538_v23, %v1539_v27  ;;  %v682_v3 = vmax.f32 %v404_v61, 0.0  ;;  %v564_v5 = vadd.f32 %v2708_v4, %v563_v56 }
 0x136   :  { %v2939_v57 = vsel %vm1825_vm3, %v1509_v39, -inf  ;;  %v2942_v29 = vsel %vm1825_vm3, %v1516_v8, -inf  ;;  %v1493_v48 = vmax.f32 %v1491_v20, %v1492_v21  ;;  %v1093_v10 = vrot.slane %v1092_v53, 2 }
 0x137   :  { %v1047_v31 = vmax.f32 %v1045_v24, %v1046_v40  ;;  %v1087_v43 = vmax.f32 %v1085_v26, %v1086_v54  ;;  %v810_v50 = vcombine.high %v682_v3, %v682_v3  ;;  %v1069_v47 = vsel %vm928_vm2, %v682_v3, -inf }
 0x138   :  { %v1054_v13 = vmax.f32 %v1052_v30, %v1053_v55  ;;  %v1500_v11 = vmax.f32 %v1498_v33, %v1499_v58  ;;  %v1534_v32 = vrot.slane %v1533_v49, 2  ;;  %v1070_v51 = vrot.slane %v1069_v47, 4 }
 0x139   :  { %v1541_v52 = vrot.slane %v1540_v1, 2  ;;  %v1076_v2 = vsel %vm928_vm2, %v810_v50, -inf  ;;  %v714_v9 = vmax.f32 %v564_v5, 0.0  ;;  %v419_v12 = vadd.f32 %v2303_v46, %v2708_v4 }
 0x13a   :  { %v1494_v17 = vrot.slane %v1493_v48, 1  ;;  %v1094_v35 = vmax.f32 %v1092_v53, %v1093_v10  ;;  %v1071_v63 = vmax.f32 %v1069_v47, %v1070_v51  ;;  %v1077_v7 = vrot.slane %v1076_v2, 4 }
 0x13b   :  { %v1088_v6 = vrot.slane %v1087_v43, 1  ;;  %v842_v18 = vcombine.high %v714_v9, %v714_v9  ;;  %v1517_v19 = vsel %vm928_vm2, %v714_v9, -inf  ;;  %v685_v14 = vmax.f32 %v419_v12, 0.0 }
 0x13c   :  { %v1535_v20 = vmax.f32 %v1533_v49, %v1534_v32  ;;  %v1072_v15 = vrot.slane %v1071_v63, 2  ;;  %v1078_v23 = vmax.f32 %v1076_v2, %v1077_v7  ;;  %v1518_v28 = vrot.slane %v1517_v19, 4 }
 0x13d   :  { %v1501_v24 = vrot.slane %v1500_v11, 1  ;;  %v1542_v26 = vmax.f32 %v1540_v1, %v1541_v52  ;;  %v1524_v30 = vsel %vm928_vm2, %v842_v18, -inf  ;;  %v1111_v33 = vsel %vm928_vm2, %v685_v14, -inf }
 0x13e   :  { %v1095_v16 = vrot.slane %v1094_v35, 1  ;;  %v1073_v34 = vmax.f32 %v1071_v63, %v1072_v15  ;;  %v1079_v42 = vrot.slane %v1078_v23, 2  ;;  %v813_v27 = vcombine.high %v685_v14, %v685_v14 }
 0x13f   :  { %v2951_v39 = vsel %vm1825_vm3, %v1047_v31, -inf  ;;  %v1519_v8 = vmax.f32 %v1517_v19, %v1518_v28  ;;  %v1525_v21 = vrot.slane %v1524_v30, 4  ;;  %v579_v53 = vadd.f32 %v2351_v22, %v2708_v4 }
 0x140   :  { %v1495_v56 = vmax.f32 %v1493_v48, %v1494_v17  ;;  %v1536_v40 = vrot.slane %v1535_v20, 1  ;;  %v1112_v54 = vrot.slane %v1111_v33, 4  ;;  %v414_v61 = vadd.f32 %v2708_v4, %v413_v36 }
 0x141   :  { %v1089_v55 = vmax.f32 %v1087_v43, %v1088_v6  ;;  %v1543_v58 = vrot.slane %v1542_v26, 1  ;;  %v1080_v49 = vmax.f32 %v1078_v23, %v1079_v42  ;;  %v717_v1 = vmax.f32 %v579_v53, 0.0 }
 0x142   :  { %v1502_v3 = vmax.f32 %v1500_v11, %v1501_v24  ;;  %v1096_v5 = vmax.f32 %v1094_v35, %v1095_v16  ;;  %v1074_v10 = vrot.slane %v1073_v34, 1  ;;  %v1118_v46 = vsel %vm928_vm2, %v813_v27, -inf  ;;  %v573_v16 = vpop.f32.mrf.mxu1 }
 0x143   :  { %v1520_v31 = vrot.slane %v1519_v8, 2  ;;  %v1526_v50 = vmax.f32 %v1524_v30, %v1525_v21  ;;  %v845_v47 = vcombine.high %v717_v1, %v717_v1  ;;  %v1559_v32 = vsel %vm928_vm2, %v717_v1, -inf }
 0x144   :  { %v2958_v48 = vsel %vm1825_vm3, %v1054_v13, -inf  ;;  %v1537_v51 = vmax.f32 %v1535_v20, %v1536_v40  ;;  %v1113_v52 = vmax.f32 %v1111_v33, %v1112_v54  ;;  %v684_v4 = vmax.f32 %v414_v61, 0.0 }
 0x145   :  { %v2961_v43 = vsel %vm1825_vm3, %v1495_v56, -inf  ;;  %v2964_v11 = vsel %vm1825_vm3, %v1089_v55, -inf  ;;  %v1544_v2 = vmax.f32 %v1542_v26, %v1543_v58  ;;  %v1081_v9 = vrot.slane %v1080_v49, 1  ;;  %v2998_v58 = vld [vmem:[%s3521_s2] ss:$0 sm:$0xff] }
 0x146   :  { %v2967_v12 = vsel %vm1825_vm3, %v1096_v5, -inf  ;;  %v1119_v17 = vrot.slane %v1118_v46, 4  ;;  %v1560_v35 = vrot.slane %v1559_v32, 4  ;;  %v1566_v63 = vsel %vm928_vm2, %v845_v47, -inf }
 0x147   :  { %v2971_v13 = vsel %vm1825_vm3, %v1502_v3, -inf  ;;  %v1075_v7 = vmax.f32 %v1073_v34, %v1074_v10  ;;  %v1521_v6 = vmax.f32 %v1519_v8, %v1520_v31  ;;  %v1527_v18 = vrot.slane %v1526_v50, 2  ;;  %v2306_v34 = vpop.f32.mrf.mxu0 }
 0x148   :  { %v2974_v19 = vsel %vm1825_vm3, %v1537_v51, -inf  ;;  %v1114_v14 = vrot.slane %v1113_v52, 2  ;;  %v1567_v20 = vrot.slane %v1566_v63, 4  ;;  %v812_v15 = vcombine.high %v684_v4, %v684_v4  ;;  %v2354_v51 = vpop.f32.mrf.mxu1 }
 0x149   :  { %v1870_v23 = vmax.f32 %v2919_v44, %v2964_v11  ;;  %v1877_v28 = vmax.f32 %v2922_v45, %v2967_v12  ;;  %v2981_v22 = vsel %vm1825_vm3, %v1544_v2, -inf  ;;  %v1082_v24 = vmax.f32 %v1080_v49, %v1081_v9 }
 0x14a   :  { %v1120_v26 = vmax.f32 %v1118_v46, %v1119_v17  ;;  %v1561_v30 = vmax.f32 %v1559_v32, %v1560_v35  ;;  %v1097_v33 = vsel %vm928_vm2, %v684_v4, -inf  ;;  %v1104_v36 = vsel %vm928_vm2, %v812_v15, -inf }
 0x14b   :  { %v1982_v42 = vmax.f32 %v2939_v57, %v2974_v19  ;;  %v2988_v27 = vsel %vm1825_vm3, %v1075_v7, -inf  ;;  %v1522_v8 = vrot.slane %v1521_v6, 1  ;;  %v1528_v21 = vmax.f32 %v1526_v50, %v1527_v18  ;;  %v423_v18 = vpop.f32.mrf.mxu0 }
 0x14c   :  { %v1115_v53 = vmax.f32 %v1113_v52, %v1114_v14  ;;  %v1568_v56 = vmax.f32 %v1566_v63, %v1567_v20  ;;  %v1098_v40 = vrot.slane %v1097_v33, 4  ;;  %v1105_v54 = vrot.slane %v1104_v36, 4 }
 0x14d   :  { %v1989_v61 = vmax.f32 %v2942_v29, %v2981_v22  ;;  %v2993_v55 = vsel %vm1825_vm3, %v1082_v24, -inf  ;;  %v574_v49 = vadd.f32 %v2998_v58, %v573_v16  ;;  %v429_v1 = vadd.f32 %v2998_v58, %v2306_v34 }
 0x14e   :  { %v1121_v3 = vrot.slane %v1120_v26, 2  ;;  %v1562_v5 = vrot.slane %v1561_v30, 2  ;;  %v1099_v10 = vmax.f32 %v1097_v33, %v1098_v40  ;;  %v1106_v46 = vmax.f32 %v1104_v36, %v1105_v54 }
 0x14f   :  { %v1856_v31 = vmax.f32 %v2951_v39, %v2988_v27  ;;  %v1523_v50 = vmax.f32 %v1521_v6, %v1522_v8  ;;  %v716_v47 = vmax.f32 %v574_v49, 0.0  ;;  %v687_v32 = vmax.f32 %v429_v1, 0.0 }
 0x150   :  { %v1529_v4 = vrot.slane %v1528_v21, 1  ;;  %v1116_v2 = vrot.slane %v1115_v53, 1  ;;  %v1569_v9 = vrot.slane %v1568_v56, 2  ;;  %v1100_v17 = vrot.slane %v1099_v10, 2 }
 0x151   :  { %v844_v35 = vcombine.high %v716_v47, %v716_v47  ;;  %v1545_v63 = vsel %vm928_vm2, %v716_v47, -inf  ;;  %v815_v7 = vcombine.high %v687_v32, %v687_v32  ;;  %v1122_v14 = vmax.f32 %v1120_v26, %v1121_v3 }
 0x152   :  { %v1563_v20 = vmax.f32 %v1561_v30, %v1562_v5  ;;  %v1107_v15 = vrot.slane %v1106_v46, 2  ;;  %v589_v6 = vadd.f32 %v2998_v58, %v2354_v51  ;;  %v1546_v24 = vrot.slane %v1545_v63, 4 }
 0x153   :  { %v1552_v33 = vsel %vm928_vm2, %v844_v35, -inf  ;;  %v1139_v36 = vsel %vm928_vm2, %v687_v32, -inf  ;;  %v1146_v16 = vsel %vm928_vm2, %v815_v7, -inf  ;;  %v1530_v34 = vmax.f32 %v1528_v21, %v1529_v4 }
 0x154   :  { %v1570_v8 = vmax.f32 %v1568_v56, %v1569_v9  ;;  %v1553_v40 = vrot.slane %v1552_v33, 4  ;;  %v424_v54 = vadd.f32 %v2998_v58, %v423_v18  ;;  %v1101_v49 = vmax.f32 %v1099_v10, %v1100_v17 }
 0x155   :  { %v1547_v1 = vmax.f32 %v1545_v63, %v1546_v24  ;;  %v1140_v47 = vrot.slane %v1139_v36, 4  ;;  %v1147_v26 = vrot.slane %v1146_v16, 4  ;;  %v3013_v30 = vsel %vm1825_vm3, %v1523_v50, -inf }
 0x156   :  { %v1123_v3 = vrot.slane %v1122_v14, 1  ;;  %v1554_v5 = vmax.f32 %v1552_v33, %v1553_v40  ;;  %v719_v51 = vmax.f32 %v589_v6, 0.0  ;;  %v1564_v35 = vrot.slane %v1563_v20, 1 }
 0x157   :  { %v1108_v0 = vmax.f32 %v1106_v46, %v1107_v15  ;;  %v1548_v32 = vrot.slane %v1547_v1, 2  ;;  %v1141_v37 = vmax.f32 %v1139_v36, %v1140_v47  ;;  %v1148_v21 = vmax.f32 %v1146_v16, %v1147_v26 }
 0x158   :  { %v1555_v7 = vrot.slane %v1554_v5, 2  ;;  %v847_v56 = vcombine.high %v719_v51, %v719_v51  ;;  %v686_v4 = vmax.f32 %v424_v54, 0.0  ;;  %v1571_v9 = vrot.slane %v1570_v8, 1 }
 0x159   :  { %v1102_v17 = vrot.slane %v1101_v49, 1  ;;  %v1549_v63 = vmax.f32 %v1547_v1, %v1548_v32  ;;  %v1974_v50 = vsel %vm1825_vm3, %v1530_v34, -inf  ;;  %v1117_v18 = vmax.f32 %v1115_v53, %v1116_v2 }
 0x15a   :  { %v1556_v24 = vmax.f32 %v1554_v5, %v1555_v7  ;;  %v1142_v33 = vrot.slane %v1141_v37, 2  ;;  %v1124_v6 = vmax.f32 %v1122_v14, %v1123_v3  ;;  %v1565_v40 = vmax.f32 %v1563_v20, %v1564_v35 }
 0x15b   :  { %v1587_v46 = vsel %vm928_vm2, %v719_v51, -inf  ;;  %v1594_v15 = vsel %vm928_vm2, %v847_v56, -inf  ;;  %v1109_v36 = vrot.slane %v1108_v0, 1  ;;  %v1149_v16 = vrot.slane %v1148_v21, 2 }
 0x15c   :  { %v814_v54 = vcombine.high %v686_v4, %v686_v4  ;;  %v1125_v47 = vsel %vm928_vm2, %v686_v4, -inf  ;;  %v1572_v26 = vmax.f32 %v1570_v8, %v1571_v9  ;;  %v1103_v10 = vmax.f32 %v1101_v49, %v1102_v17  ;;  %v583_v49 = vpop.f32.mrf.mxu1 }
 0x15d   :  { %v1550_v52 = vrot.slane %v1549_v63, 1  ;;  %v1557_v1 = vrot.slane %v1556_v24, 1  ;;  %v1143_v32 = vmax.f32 %v1141_v37, %v1142_v33  ;;  %v1588_v34 = vrot.slane %v1587_v46, 4 }
 0x15e   :  { %v1595_v53 = vrot.slane %v1594_v15, 4  ;;  %v1126_v2 = vrot.slane %v1125_v47, 4  ;;  %v1975_v14 = vmax.f32 %v2971_v13, %v1974_v50  ;;  %v1871_v20 = vsel %vm1825_vm3, %v1117_v18, -inf }
 0x15f   :  { %v1878_v3 = vsel %vm1825_vm3, %v1124_v6, -inf  ;;  %v1132_v5 = vsel %vm928_vm2, %v814_v54, -inf  ;;  %v1983_v51 = vsel %vm1825_vm3, %v1565_v40, -inf  ;;  %v1110_v35 = vmax.f32 %v1108_v0, %v1109_v36 }
 0x160   :  { %v1150_v7 = vmax.f32 %v1148_v21, %v1149_v16  ;;  %v1127_v8 = vmax.f32 %v1125_v47, %v1126_v2  ;;  %v1990_v56 = vsel %vm1825_vm3, %v1572_v26, -inf  ;;  %v1857_v37 = vsel %vm1825_vm3, %v1103_v10, -inf  ;;  %v2309_v10 = vpop.f32.mrf.mxu0 }
 0x161   :  { %v1551_v4 = vmax.f32 %v1549_v63, %v1550_v52  ;;  %v1558_v9 = vmax.f32 %v1556_v24, %v1557_v1  ;;  %v1144_v17 = vrot.slane %v1143_v32, 1  ;;  %v1589_v13 = vmax.f32 %v1587_v46, %v1588_v34  ;;  %v2357_v24 = vpop.f32.mrf.mxu1 }
 0x162   :  { %v1596_v50 = vmax.f32 %v1594_v15, %v1595_v53  ;;  %v1133_v18 = vrot.slane %v1132_v5, 4  ;;  %v3031_v33 = vmax.f32 %v1870_v23, %v1871_v20  ;;  %v3036_v0 = vmax.f32 %v1877_v28, %v1878_v3  ;;  %v433_v53 = vpop.f32.mrf.mxu0 }
 0x163   :  { %v3041_v21 = vmax.f32 %v1982_v42, %v1983_v51  ;;  %v1128_v52 = vrot.slane %v1127_v8, 2  ;;  %v3046_v63 = vmax.f32 %v1989_v61, %v1990_v56  ;;  %v1864_v44 = vsel %vm1825_vm3, %v1110_v35, -inf }
 0x164   :  { %v1151_v11 = vrot.slane %v1150_v7, 1  ;;  %v1134_v23 = vmax.f32 %v1132_v5, %v1133_v18  ;;  %v3052_v45 = vmax.f32 %v1856_v31, %v1857_v37  ;;  %v1969_v57 = vsel %vm1825_vm3, %v1551_v4, -inf }
 0x165   :  { %v1976_v12 = vsel %vm1825_vm3, %v1558_v9, -inf  ;;  %v584_v19 = vadd.f32 %v2998_v58, %v583_v49  ;;  %v1145_v28 = vmax.f32 %v1143_v32, %v1144_v17  ;;  %v1590_v29 = vrot.slane %v1589_v13, 2 }
 0x166   :  { %v1597_v22 = vrot.slane %v1596_v50, 2  ;;  %v439_v42 = vadd.f32 %v2998_v58, %v2309_v10  ;;  %v3525_v61 = vmax.f32 %v2958_v48, %v2993_v55  ;;  %v1129_v40 = vmax.f32 %v1127_v8, %v1128_v52 }
 0x167   :  { %v718_v39 = vmax.f32 %v584_v19, 0.0  ;;  %v599_v27 = vadd.f32 %v2998_v58, %v2357_v24  ;;  %v3526_v31 = vmax.f32 %v2961_v43, %v3013_v30  ;;  %v3069_v15 = vmax.f32 %v1975_v14, %v1976_v12 }
 0x168   :  { %v3061_v6 = vmax.f32 %v3525_v61, %v1864_v44  ;;  %v1152_v36 = vmax.f32 %v1150_v7, %v1151_v11  ;;  %v1135_v16 = vrot.slane %v1134_v23, 2  ;;  %v689_v26 = vmax.f32 %v439_v42, 0.0 }
 0x169   :  { %v3067_v46 = vmax.f32 %v3526_v31, %v1969_v57  ;;  %v846_v54 = vcombine.high %v718_v39, %v718_v39  ;;  %v1573_v47 = vsel %vm928_vm2, %v718_v39, -inf  ;;  %v721_v48 = vmax.f32 %v599_v27, 0.0 }
 0x16a   :  { %v3073_v55 = vsel %vm1825_vm3, %v1145_v28, -inf  ;;  %v1591_v1 = vmax.f32 %v1589_v13, %v1590_v29  ;;  %v1598_v32 = vmax.f32 %v1596_v50, %v1597_v22  ;;  %v1574_v34 = vrot.slane %v1573_v47, 4 }
 0x16b   :  { %v1130_v2 = vrot.slane %v1129_v40, 1  ;;  %v1580_v43 = vsel %vm928_vm2, %v846_v54, -inf  ;;  %v817_v30 = vcombine.high %v689_v26, %v689_v26  ;;  %v1167_v14 = vsel %vm928_vm2, %v689_v26, -inf }
 0x16c   :  { %v1136_v20 = vmax.f32 %v1134_v23, %v1135_v16  ;;  %v1575_v3 = vmax.f32 %v1573_v47, %v1574_v34  ;;  %v1581_v5 = vrot.slane %v1580_v43, 4  ;;  %v1168_v51 = vrot.slane %v1167_v14, 4 }
 0x16d   :  { %v1174_v35 = vsel %vm928_vm2, %v817_v30, -inf  ;;  %v849_v7 = vcombine.high %v721_v48, %v721_v48  ;;  %v1615_v8 = vsel %vm928_vm2, %v721_v48, -inf  ;;  %v434_v49 = vadd.f32 %v2998_v58, %v433_v53  ;;  %v593_v53 = vpop.f32.mrf.mxu1 }
 0x16e   :  { %v3081_v56 = vsel %vm1825_vm3, %v1152_v36, -inf  ;;  %v1592_v37 = vrot.slane %v1591_v1, 1  ;;  %v1576_v4 = vrot.slane %v1575_v3, 2  ;;  %v1582_v9 = vmax.f32 %v1580_v43, %v1581_v5 }
 0x16f   :  { %v1599_v17 = vrot.slane %v1598_v32, 1  ;;  %v1131_v13 = vmax.f32 %v1129_v40, %v1130_v2  ;;  %v1169_v50 = vmax.f32 %v1167_v14, %v1168_v51  ;;  %v1622_v18 = vsel %vm928_vm2, %v849_v7, -inf }
 0x170   :  { %v1137_v52 = vrot.slane %v1136_v20, 1  ;;  %v1583_v10 = vrot.slane %v1582_v9, 2  ;;  %v1175_v44 = vrot.slane %v1174_v35, 4  ;;  %v1616_v11 = vrot.slane %v1615_v8, 4 }
 0x171   :  { %v1577_v24 = vmax.f32 %v1575_v3, %v1576_v4  ;;  %v1623_v57 = vrot.slane %v1622_v18, 4  ;;  %v688_v12 = vmax.f32 %v434_v49, 0.0  ;;  %v1593_v28 = vmax.f32 %v1591_v1, %v1592_v37  ;;  %v2360_v4 = vpop.f32.mrf.mxu1 }
 0x172   :  { %v1584_v29 = vmax.f32 %v1582_v9, %v1583_v10  ;;  %v1600_v22 = vmax.f32 %v1598_v32, %v1599_v17  ;;  %v1170_v42 = vrot.slane %v1169_v50, 2  ;;  %v1138_v39 = vmax.f32 %v1136_v20, %v1137_v52  ;;  %v2312_v20 = vpop.f32.mrf.mxu0 }
 0x173   :  { %v816_v61 = vcombine.high %v688_v12, %v688_v12  ;;  %v1153_v40 = vsel %vm928_vm2, %v688_v12, -inf  ;;  %v1859_v27 = vsel %vm1825_vm3, %v1131_v13, -inf  ;;  %v1176_v31 = vmax.f32 %v1174_v35, %v1175_v44 }
 0x174   :  { %v1617_v36 = vmax.f32 %v1615_v8, %v1616_v11  ;;  %v3527_v16 = vmax.f32 %v2827_v41, %v2868_v60  ;;  %v1578_v47 = vrot.slane %v1577_v24, 1  ;;  %v1624_v26 = vmax.f32 %v1622_v18, %v1623_v57 }
 0x175   :  { %v1160_v48 = vsel %vm928_vm2, %v816_v61, -inf  ;;  %v3097_v1 = vsel %vm1825_vm3, %v1593_v28, -inf  ;;  %v1585_v32 = vrot.slane %v1584_v29, 1  ;;  %v1154_v34 = vrot.slane %v1153_v40, 4 }
 0x176   :  { %v2087_v54 = vsel %vm2086_vm6, %v3527_v16, %v2929_v25  ;;  %v3100_v2 = vsel %vm1825_vm3, %v1600_v22, -inf  ;;  %v1860_v43 = vmax.f32 %v3052_v45, %v1859_v27  ;;  %v1171_v41 = vmax.f32 %v1169_v50, %v1170_v42 }
 0x177   :  { %v1866_v60 = vsel %vm1825_vm3, %v1138_v39, -inf  ;;  %v1177_v25 = vrot.slane %v1176_v31, 2  ;;  %v1618_v30 = vrot.slane %v1617_v36, 2  ;;  %v1161_v14 = vrot.slane %v1160_v48, 4 }
 0x178   :  { %v1579_v5 = vmax.f32 %v1577_v24, %v1578_v47  ;;  %v3528_v51 = vmax.f32 %v2842_v59, %v2893_v38  ;;  %v1625_v7 = vrot.slane %v1624_v26, 2  ;;  %v1586_v8 = vmax.f32 %v1584_v29, %v1585_v32  ;;  %v443_v24 = vpop.f32.mrf.mxu0 }
 0x179   :  { %v1155_v49 = vmax.f32 %v1153_v40, %v1154_v34  ;;  %v594_v37 = vadd.f32 %v2998_v58, %v593_v53  ;;  %v1867_v9 = vmax.f32 %v3061_v6, %v1866_v60  ;;  %v2089_v17 = vsel %vm2088_vm7, %v1860_v43, %v2087_v54 }
 0x17a   :  { %v2105_v35 = vsel %vm2086_vm6, %v3528_v51, %v2935_v62  ;;  %v1172_v13 = vrot.slane %v1171_v41, 1  ;;  %v449_v50 = vadd.f32 %v2998_v58, %v2312_v20  ;;  %v1178_v18 = vmax.f32 %v1176_v31, %v1177_v25 }
 0x17b   :  { %v1619_v59 = vmax.f32 %v1617_v36, %v1618_v30  ;;  %v1162_v38 = vmax.f32 %v1160_v48, %v1161_v14  ;;  %v720_v62 = vmax.f32 %v594_v37, 0.0  ;;  %v1971_v52 = vsel %vm1825_vm3, %v1579_v5, -inf  ;;  %v603_v30 = vpop.f32.mrf.mxu1 }
 0x17c   :  { %v1626_v10 = vmax.f32 %v1624_v26, %v1625_v7  ;;  %v691_v44 = vmax.f32 %v449_v50, 0.0  ;;  %v609_v11 = vadd.f32 %v2998_v58, %v2360_v4  ;;  %v1978_v57 = vsel %vm1825_vm3, %v1586_v8, -inf }
 0x17d   :  { %v1156_v12 = vrot.slane %v1155_v49, 2  ;;  %v848_v6 = vcombine.high %v720_v62, %v720_v62  ;;  %v1601_v28 = vsel %vm928_vm2, %v720_v62, -inf  ;;  %v1163_v40 = vrot.slane %v1162_v38, 2 }
 0x17e   :  { %v1602_v29 = vrot.slane %v1601_v28, 4  ;;  %v819_v22 = vcombine.high %v691_v44, %v691_v44  ;;  %v1195_v42 = vsel %vm928_vm2, %v691_v44, -inf  ;;  %v723_v61 = vmax.f32 %v609_v11, 0.0 }
 0x17f   :  { %v1608_v39 = vsel %vm928_vm2, %v848_v6, -inf  ;;  %v1196_v27 = vrot.slane %v1195_v42, 4  ;;  %v444_v31 = vadd.f32 %v2998_v58, %v443_v24  ;;  %v3126_v26 = vsel %vm2090_vm8, %v1867_v9, %v2089_v17 }
 0x180   :  { %v1603_v36 = vmax.f32 %v1601_v28, %v1602_v29  ;;  %v1609_v16 = vrot.slane %v1608_v39, 4  ;;  %v1202_v54 = vsel %vm928_vm2, %v819_v22, -inf  ;;  %v851_v47 = vcombine.high %v723_v61, %v723_v61 }
 0x181   :  { %v1972_v48 = vmax.f32 %v3067_v46, %v1971_v52  ;;  %v1197_v32 = vmax.f32 %v1195_v42, %v1196_v27  ;;  %v1203_v34 = vrot.slane %v1202_v54, 4  ;;  %v1173_v53 = vmax.f32 %v1171_v41, %v1172_v13  ;;  %v2315_v27 = vpop.f32.mrf.mxu0 }
 0x182   :  { %v1179_v43 = vrot.slane %v1178_v18, 1  ;;  %v1604_v60 = vrot.slane %v1603_v36, 2  ;;  %v1610_v25 = vmax.f32 %v1608_v39, %v1609_v16  ;;  %v1979_v14 = vmax.f32 %v3069_v15, %v1978_v57 }
 0x183   :  { %v1620_v20 = vrot.slane %v1619_v59, 1  ;;  %v1627_v5 = vrot.slane %v1626_v10, 1  ;;  %v1643_v51 = vsel %vm928_vm2, %v723_v61, -inf  ;;  %v1157_v7 = vmax.f32 %v1155_v49, %v1156_v12 }
 0x184   :  { %v1164_v8 = vmax.f32 %v1162_v38, %v1163_v40  ;;  %v1650_v37 = vsel %vm928_vm2, %v851_v47, -inf  ;;  %v690_v4 = vmax.f32 %v444_v31, 0.0  ;;  %v2106_v46 = vsel %vm2088_vm7, %v1972_v48, %v2105_v35 }
 0x185   :  { %v1198_v9 = vrot.slane %v1197_v32, 2  ;;  %v1204_v17 = vmax.f32 %v1202_v54, %v1203_v34  ;;  %v604_v41 = vadd.f32 %v2998_v58, %v603_v30  ;;  %v1605_v13 = vmax.f32 %v1603_v36, %v1604_v60 }
 0x186   :  { %v1611_v50 = vrot.slane %v1610_v25, 2  ;;  %v1644_v62 = vrot.slane %v1643_v51, 4  ;;  %v818_v52 = vcombine.high %v690_v4, %v690_v4  ;;  %v1180_v15 = vmax.f32 %v1178_v18, %v1179_v43 }
 0x187   :  { %v1621_v44 = vmax.f32 %v1619_v59, %v1620_v20  ;;  %v1651_v11 = vrot.slane %v1650_v37, 4  ;;  %v1181_v24 = vsel %vm928_vm2, %v690_v4, -inf  ;;  %v1628_v49 = vmax.f32 %v1626_v10, %v1627_v5 }
 0x188   :  { %v1158_v38 = vrot.slane %v1157_v7, 1  ;;  %v1165_v57 = vrot.slane %v1164_v8, 1  ;;  %v1182_v12 = vrot.slane %v1181_v24, 4  ;;  %v1199_v6 = vmax.f32 %v1197_v32, %v1198_v9 }
 0x189   :  { %v1205_v28 = vrot.slane %v1204_v17, 2  ;;  %v1188_v35 = vsel %vm928_vm2, %v818_v52, -inf  ;;  %v722_v29 = vmax.f32 %v604_v41, 0.0  ;;  %v3137_v22 = vsel %vm1825_vm3, %v1173_v53, -inf }
 0x18a   :  { %v1606_v42 = vrot.slane %v1605_v13, 1  ;;  %v1612_v61 = vmax.f32 %v1610_v25, %v1611_v50  ;;  %v1645_v40 = vmax.f32 %v1643_v51, %v1644_v62  ;;  %v3140_v18 = vsel %vm2090_vm8, %v1979_v14, %v2106_v46  ;;  %v2363_v51 = vpop.f32.mrf.mxu1 }
 0x18b   :  { %v3143_v59 = vsel %vm1825_vm3, %v1180_v15, -inf  ;;  %v1652_v10 = vmax.f32 %v1650_v37, %v1651_v11  ;;  %v1189_v39 = vrot.slane %v1188_v35, 4  ;;  %v3146_v31 = vsel %vm1825_vm3, %v1621_v44, -inf }
 0x18c   :  { %v1159_v36 = vmax.f32 %v1157_v7, %v1158_v38  ;;  %v1166_v16 = vmax.f32 %v1164_v8, %v1165_v57  ;;  %v1183_v54 = vmax.f32 %v1181_v24, %v1182_v12  ;;  %v3149_v47 = vsel %vm1825_vm3, %v1628_v49, -inf  ;;  %v453_v7 = vpop.f32.mrf.mxu0 }
 0x18d   :  { %v1200_v48 = vrot.slane %v1199_v6, 1  ;;  %v1206_v32 = vmax.f32 %v1204_v17, %v1205_v28  ;;  %v850_v34 = vcombine.high %v722_v29, %v722_v29  ;;  %v1607_v53 = vmax.f32 %v1605_v13, %v1606_v42 }
 0x18e   :  { %v1613_v43 = vrot.slane %v1612_v61, 1  ;;  %v1646_v60 = vrot.slane %v1645_v40, 2  ;;  %v1629_v25 = vsel %vm928_vm2, %v722_v29, -inf  ;;  %v1653_v30 = vrot.slane %v1652_v10, 2 }
 0x18f   :  { %v1190_v14 = vmax.f32 %v1188_v35, %v1189_v39  ;;  %v1630_v20 = vrot.slane %v1629_v25, 4  ;;  %v1636_v5 = vsel %vm928_vm2, %v850_v34, -inf  ;;  %v3154_v8 = vsel %vm1825_vm3, %v1159_v36, -inf }
 0x190   :  { %v3157_v37 = vsel %vm1825_vm3, %v1166_v16, -inf  ;;  %v1184_v4 = vrot.slane %v1183_v54, 2  ;;  %v1637_v46 = vrot.slane %v1636_v5, 4  ;;  %v1201_v9 = vmax.f32 %v1199_v6, %v1200_v48  ;;  %v613_v48 = vpop.f32.mrf.mxu1 }
 0x191   :  { %v1207_v17 = vrot.slane %v1206_v32, 1  ;;  %v1631_v41 = vmax.f32 %v1629_v25, %v1630_v20  ;;  %v459_v13 = vadd.f32 %v2998_v58, %v2315_v27  ;;  %v1614_v50 = vmax.f32 %v1612_v61, %v1613_v43 }
 0x192   :  { %v1647_v62 = vmax.f32 %v1645_v40, %v1646_v60  ;;  %v619_v52 = vadd.f32 %v2998_v58, %v2363_v51  ;;  %v454_v15 = vadd.f32 %v2998_v58, %v453_v7  ;;  %v3163_v44 = vsel %vm1825_vm3, %v1607_v53, -inf }
 0x193   :  { %v1654_v11 = vmax.f32 %v1652_v10, %v1653_v30  ;;  %v1191_v24 = vrot.slane %v1190_v14, 2  ;;  %v693_v49 = vmax.f32 %v459_v13, 0.0  ;;  %v1185_v38 = vmax.f32 %v1183_v54, %v1184_v4 }
 0x194   :  { %v1632_v57 = vrot.slane %v1631_v41, 2  ;;  %v1638_v12 = vmax.f32 %v1636_v5, %v1637_v46  ;;  %v725_v6 = vmax.f32 %v619_v52, 0.0  ;;  %v1208_v28 = vmax.f32 %v1206_v32, %v1207_v17 }
 0x195   :  { %v3166_v35 = vsel %vm1825_vm3, %v1201_v9, -inf  ;;  %v821_v29 = vcombine.high %v693_v49, %v693_v49  ;;  %v692_v42 = vmax.f32 %v454_v15, 0.0  ;;  %v1648_v61 = vrot.slane %v1647_v62, 1 }
 0x196   :  { %v1223_v40 = vsel %vm928_vm2, %v693_v49, -inf  ;;  %v853_v39 = vcombine.high %v725_v6, %v725_v6  ;;  %v1671_v27 = vsel %vm928_vm2, %v725_v6, -inf  ;;  %v1655_v36 = vrot.slane %v1654_v11, 1 }
 0x197   :  { %v1192_v10 = vmax.f32 %v1190_v14, %v1191_v24  ;;  %v1224_v16 = vrot.slane %v1223_v40, 4  ;;  %v1230_v54 = vsel %vm928_vm2, %v821_v29, -inf  ;;  %v1186_v34 = vrot.slane %v1185_v38, 1 }
 0x198   :  { %v1633_v53 = vmax.f32 %v1631_v41, %v1632_v57  ;;  %v1639_v32 = vrot.slane %v1638_v12, 2  ;;  %v1231_v43 = vrot.slane %v1230_v54, 4  ;;  %v1672_v25 = vrot.slane %v1671_v27, 4 }
 0x199   :  { %v1225_v60 = vmax.f32 %v1223_v40, %v1224_v16  ;;  %v1678_v30 = vsel %vm928_vm2, %v853_v39, -inf  ;;  %v820_v20 = vcombine.high %v692_v42, %v692_v42  ;;  %v3173_v5 = vsel %vm1825_vm3, %v1614_v50, -inf }
 0x19a   :  { %v1649_v51 = vmax.f32 %v1647_v62, %v1648_v61  ;;  %v1679_v7 = vrot.slane %v1678_v30, 4  ;;  %v614_v14 = vadd.f32 %v2998_v58, %v613_v48  ;;  %v1193_v4 = vrot.slane %v1192_v10, 1  ;;  %v2318_v48 = vpop.f32.mrf.mxu0 }
 0x19b   :  { %v1226_v46 = vrot.slane %v1225_v60, 2  ;;  %v1209_v9 = vsel %vm928_vm2, %v692_v42, -inf  ;;  %v1216_v17 = vsel %vm928_vm2, %v820_v20, -inf  ;;  %v1898_v41 = vmax.f32 %v3137_v22, %v3166_v35 }
 0x19c   :  { %v1656_v13 = vmax.f32 %v1654_v11, %v1655_v36  ;;  %v1634_v52 = vrot.slane %v1633_v53, 1  ;;  %v1640_v15 = vmax.f32 %v1638_v12, %v1639_v32  ;;  %v1187_v24 = vmax.f32 %v1185_v38, %v1186_v34 }
 0x19d   :  { %v1232_v49 = vmax.f32 %v1230_v54, %v1231_v43  ;;  %v1673_v50 = vmax.f32 %v1671_v27, %v1672_v25  ;;  %v1210_v57 = vrot.slane %v1209_v9, 4  ;;  %v1227_v62 = vmax.f32 %v1225_v60, %v1226_v46  ;;  %v2366_v46 = vpop.f32.mrf.mxu1 }
 0x19e   :  { %v1680_v6 = vmax.f32 %v1678_v30, %v1679_v7  ;;  %v1217_v29 = vrot.slane %v1216_v17, 4  ;;  %v724_v61 = vmax.f32 %v614_v14, 0.0  ;;  %v3181_v40 = vsel %vm1825_vm3, %v1208_v28, -inf }
 0x19f   :  { %v3184_v42 = vsel %vm1825_vm3, %v1649_v51, -inf  ;;  %v1194_v39 = vmax.f32 %v1192_v10, %v1193_v4  ;;  %v1211_v16 = vmax.f32 %v1209_v9, %v1210_v57  ;;  %v3187_v11 = vsel %vm1825_vm3, %v1656_v13, -inf }
 0x1a0   :  { %v1635_v38 = vmax.f32 %v1633_v53, %v1634_v52  ;;  %v1641_v12 = vrot.slane %v1640_v15, 1  ;;  %v1218_v27 = vmax.f32 %v1216_v17, %v1217_v29  ;;  %v3190_v36 = vsel %vm1825_vm3, %v1187_v24, -inf }
 0x1a1   :  { %v1233_v54 = vrot.slane %v1232_v49, 2  ;;  %v852_v34 = vcombine.high %v724_v61, %v724_v61  ;;  %v1657_v28 = vsel %vm928_vm2, %v724_v61, -inf  ;;  %v1228_v32 = vrot.slane %v1227_v62, 1 }
 0x1a2   :  { %v1674_v43 = vrot.slane %v1673_v50, 2  ;;  %v1681_v60 = vrot.slane %v1680_v6, 2  ;;  %v469_v10 = vadd.f32 %v2998_v58, %v2318_v48  ;;  %v3199_v30 = vsel %vm1825_vm3, %v1194_v39, -inf }
 0x1a3   :  { %v1212_v20 = vrot.slane %v1211_v16, 2  ;;  %v1642_v51 = vmax.f32 %v1640_v15, %v1641_v12  ;;  %v3202_v7 = vsel %vm1825_vm3, %v1635_v38, -inf  ;;  %v1219_v14 = vrot.slane %v1218_v27, 2  ;;  %v463_v15 = vpop.f32.mrf.mxu0 }
 0x1a4   :  { %v1658_v4 = vrot.slane %v1657_v28, 4  ;;  %v1234_v13 = vmax.f32 %v1232_v49, %v1233_v54  ;;  %v1664_v52 = vsel %vm928_vm2, %v852_v34, -inf  ;;  %v1229_v24 = vmax.f32 %v1227_v62, %v1228_v32 }
 0x1a5   :  { %v1675_v57 = vmax.f32 %v1673_v50, %v1674_v43  ;;  %v1682_v29 = vmax.f32 %v1680_v6, %v1681_v60  ;;  %v695_v61 = vmax.f32 %v469_v10, 0.0  ;;  %v1213_v38 = vmax.f32 %v1211_v16, %v1212_v20 }
 0x1a6   :  { %v629_v12 = vadd.f32 %v2998_v58, %v2366_v46  ;;  %v3215_v45 = vsel %vm1825_vm3, %v1642_v51, -inf  ;;  %v1220_v49 = vmax.f32 %v1218_v27, %v1219_v14  ;;  %v1659_v54 = vmax.f32 %v1657_v28, %v1658_v4 }
 0x1a7   :  { %v1665_v34 = vrot.slane %v1664_v52, 4  ;;  %v823_v62 = vcombine.high %v695_v61, %v695_v61  ;;  %v1251_v50 = vsel %vm928_vm2, %v695_v61, -inf  ;;  %v464_v32 = vadd.f32 %v2998_v58, %v463_v15 }
 0x1a8   :  { %v727_v6 = vmax.f32 %v629_v12, 0.0  ;;  %v1235_v43 = vrot.slane %v1234_v13, 1  ;;  %v1899_v60 = vsel %vm1825_vm3, %v1229_v24, -inf  ;;  %v1676_v10 = vrot.slane %v1675_v57, 1 }
 0x1a9   :  { %v1683_v3 = vrot.slane %v1682_v29, 1  ;;  %v1214_v16 = vrot.slane %v1213_v38, 1  ;;  %v1252_v20 = vrot.slane %v1251_v50, 4  ;;  %v1258_v46 = vsel %vm928_vm2, %v823_v62, -inf }
 0x1aa   :  { %v855_v51 = vcombine.high %v727_v6, %v727_v6  ;;  %v1221_v19 = vrot.slane %v1220_v49, 1  ;;  %v1660_v27 = vrot.slane %v1659_v54, 2  ;;  %v1259_v28 = vrot.slane %v1258_v46, 4 }
 0x1ab   :  { %v1699_v14 = vsel %vm928_vm2, %v727_v6, -inf  ;;  %v1666_v4 = vmax.f32 %v1664_v52, %v1665_v34  ;;  %v694_v15 = vmax.f32 %v464_v32, 0.0  ;;  %v1236_v23 = vmax.f32 %v1234_v13, %v1235_v43  ;;  %v623_v43 = vpop.f32.mrf.mxu1 }
 0x1ac   :  { %v1700_v61 = vrot.slane %v1699_v14, 4  ;;  %v1706_v12 = vsel %vm928_vm2, %v855_v51, -inf  ;;  %v1677_v48 = vmax.f32 %v1675_v57, %v1676_v10  ;;  %v1253_v24 = vmax.f32 %v1251_v50, %v1252_v20 }
 0x1ad   :  { %v1260_v39 = vmax.f32 %v1258_v46, %v1259_v28  ;;  %v1684_v17 = vmax.f32 %v1682_v29, %v1683_v3  ;;  %v1707_v9 = vrot.slane %v1706_v12, 4  ;;  %v822_v53 = vcombine.high %v694_v15, %v694_v15  ;;  %v2321_v46 = vpop.f32.mrf.mxu0 }
 0x1ae   :  { %v1237_v62 = vsel %vm928_vm2, %v694_v15, -inf  ;;  %v2003_v25 = vmax.f32 %v3173_v5, %v3215_v45  ;;  %v3229_v52 = vmax.f32 %v1898_v41, %v1899_v60  ;;  %v1215_v34 = vmax.f32 %v1213_v38, %v1214_v16 }
 0x1af   :  { %v1222_v6 = vmax.f32 %v1220_v49, %v1221_v19  ;;  %v1661_v32 = vmax.f32 %v1659_v54, %v1660_v27  ;;  %v1667_v13 = vrot.slane %v1666_v4, 2  ;;  %v1701_v57 = vmax.f32 %v1699_v14, %v1700_v61 }
 0x1b0   :  { %v1238_v50 = vrot.slane %v1237_v62, 4  ;;  %v1906_v3 = vsel %vm1825_vm3, %v1236_v23, -inf  ;;  %v1254_v29 = vrot.slane %v1253_v24, 2  ;;  %v1261_v10 = vrot.slane %v1260_v39, 2 }
 0x1b1   :  { %v1244_v20 = vsel %vm928_vm2, %v822_v53, -inf  ;;  %v2011_v51 = vsel %vm1825_vm3, %v1677_v48, -inf  ;;  %v2018_v22 = vsel %vm1825_vm3, %v1684_v17, -inf  ;;  %v1708_v35 = vmax.f32 %v1706_v12, %v1707_v9 }
 0x1b2   :  { %v1239_v41 = vmax.f32 %v1237_v62, %v1238_v50  ;;  %v1885_v19 = vsel %vm1825_vm3, %v1215_v34, -inf  ;;  %v1892_v38 = vsel %vm1825_vm3, %v1222_v6, -inf  ;;  %v1245_v49 = vrot.slane %v1244_v20, 4 }
 0x1b3   :  { %v624_v54 = vadd.f32 %v2998_v58, %v623_v43  ;;  %v1662_v60 = vrot.slane %v1661_v32, 1  ;;  %v1668_v23 = vmax.f32 %v1666_v4, %v1667_v13  ;;  %v1702_v16 = vrot.slane %v1701_v57, 2 }
 0x1b4   :  { %v479_v27 = vadd.f32 %v2998_v58, %v2321_v46  ;;  %v1255_v53 = vmax.f32 %v1253_v24, %v1254_v29  ;;  %v1262_v28 = vmax.f32 %v1260_v39, %v1261_v10  ;;  %v1246_v14 = vmax.f32 %v1244_v20, %v1245_v49  ;;  %v2369_v29 = vpop.f32.mrf.mxu1 }
 0x1b5   :  { %v726_v48 = vmax.f32 %v624_v54, 0.0  ;;  %v3529_v9 = vmax.f32 %v3143_v59, %v3181_v40  ;;  %v3530_v61 = vmax.f32 %v3146_v31, %v3184_v42  ;;  %v1709_v15 = vrot.slane %v1708_v35, 2 }
 0x1b6   :  { %v1240_v62 = vrot.slane %v1239_v41, 2  ;;  %v3531_v4 = vmax.f32 %v3149_v47, %v3187_v11  ;;  %v3533_v39 = vmax.f32 %v3154_v8, %v3190_v36  ;;  %v1247_v59 = vrot.slane %v1246_v14, 2 }
 0x1b7   :  { %v3242_v17 = vmax.f32 %v3529_v9, %v1906_v3  ;;  %v3247_v12 = vmax.f32 %v3530_v61, %v2011_v51  ;;  %v697_v40 = vmax.f32 %v479_v27, 0.0  ;;  %v3534_v6 = vmax.f32 %v3157_v37, %v3199_v30 }
 0x1b8   :  { %v3252_v34 = vmax.f32 %v3531_v4, %v2018_v22  ;;  %v3257_v24 = vmax.f32 %v3533_v39, %v1885_v19  ;;  %v1663_v42 = vmax.f32 %v1661_v32, %v1662_v60  ;;  %v1703_v13 = vmax.f32 %v1701_v57, %v1702_v16 }
 0x1b9   :  { %v3262_v31 = vmax.f32 %v3534_v6, %v1892_v38  ;;  %v854_v50 = vcombine.high %v726_v48, %v726_v48  ;;  %v1669_v43 = vrot.slane %v1668_v23, 1  ;;  %v1256_v3 = vrot.slane %v1255_v53, 1  ;;  %v473_v38 = vpop.f32.mrf.mxu0 }
 0x1ba   :  { %3532 = vst [vmem:[#allocation5_spill] sm:$0xff] %v3252_v34  ;;  %v1263_v47 = vrot.slane %v1262_v28, 1  ;;  %v1685_v11 = vsel %vm928_vm2, %v726_v48, -inf  ;;  %v1710_v10 = vmax.f32 %v1708_v35, %v1709_v15  ;;  %v1241_v8 = vmax.f32 %v1239_v41, %v1240_v62 }
 0x1bb   :  { %v1686_v36 = vrot.slane %v1685_v11, 4  ;;  %v1692_v20 = vsel %vm928_vm2, %v854_v50, -inf  ;;  %v1248_v46 = vmax.f32 %v1246_v14, %v1247_v59  ;;  %v825_v22 = vcombine.high %v697_v40, %v697_v40 }
 0x1bc   :  { %v1693_v51 = vrot.slane %v1692_v20, 4  ;;  %v1279_v37 = vsel %vm928_vm2, %v697_v40, -inf  ;;  %v1704_v30 = vrot.slane %v1703_v13, 1  ;;  %v639_v19 = vadd.f32 %v2998_v58, %v2369_v29 }
 0x1bd   :  { %v1687_v32 = vmax.f32 %v1685_v11, %v1686_v36  ;;  %v1280_v57 = vrot.slane %v1279_v37, 4  ;;  %v1670_v49 = vmax.f32 %v1668_v23, %v1669_v43  ;;  %v1997_v54 = vsel %vm1825_vm3, %v1663_v42, -inf  ;;  %v633_v42 = vpop.f32.mrf.mxu1 }
 0x1be   :  { %v1257_v60 = vmax.f32 %v1255_v53, %v1256_v3  ;;  %v1694_v35 = vmax.f32 %v1692_v20, %v1693_v51  ;;  %v1264_v41 = vmax.f32 %v1262_v28, %v1263_v47  ;;  %v1242_v16 = vrot.slane %v1241_v8, 1 }
 0x1bf   :  { %v1286_v27 = vsel %vm928_vm2, %v825_v22, -inf  ;;  %v729_v14 = vmax.f32 %v639_v19, 0.0  ;;  %v1249_v48 = vrot.slane %v1248_v46, 1  ;;  %v1688_v9 = vrot.slane %v1687_v32, 2 }
 0x1c0   :  { %v1281_v61 = vmax.f32 %v1279_v37, %v1280_v57  ;;  %v474_v15 = vadd.f32 %v2998_v58, %v473_v38  ;;  %v3535_v62 = vmax.f32 %v3163_v44, %v3202_v7  ;;  %v1705_v23 = vmax.f32 %v1703_v13, %v1704_v30 }
 0x1c1   :  { %v1711_v39 = vrot.slane %v1710_v10, 1  ;;  %v1695_v59 = vrot.slane %v1694_v35, 2  ;;  %v2004_v53 = vsel %vm1825_vm3, %v1670_v49, -inf  ;;  %v1287_v28 = vrot.slane %v1286_v27, 4 }
 0x1c2   :  { %v3274_v4 = vmax.f32 %v3535_v62, %v1997_v54  ;;  %v857_v40 = vcombine.high %v729_v14, %v729_v14  ;;  %v696_v6 = vmax.f32 %v474_v15, 0.0  ;;  %v3278_v50 = vsel %vm1825_vm3, %v1257_v60, -inf }
 0x1c3   :  { %v3281_v43 = vsel %vm1825_vm3, %v1264_v41, -inf  ;;  %v1243_v3 = vmax.f32 %v1241_v8, %v1242_v16  ;;  %v1727_v44 = vsel %vm928_vm2, %v729_v14, -inf  ;;  %v1250_v7 = vmax.f32 %v1248_v46, %v1249_v48  ;;  %v2324_v16 = vpop.f32.mrf.mxu0 }
 0x1c4   :  { %v1689_v47 = vmax.f32 %v1687_v32, %v1688_v9  ;;  %v1282_v13 = vrot.slane %v1281_v61, 2  ;;  %v1734_v11 = vsel %vm928_vm2, %v857_v40, -inf  ;;  %v1712_v29 = vmax.f32 %v1710_v10, %v1711_v39 }
 0x1c5   :  { %v3286_v36 = vsel %vm1825_vm3, %v1705_v23, -inf  ;;  %v1696_v20 = vmax.f32 %v1694_v35, %v1695_v59  ;;  %v634_v51 = vadd.f32 %v2998_v58, %v633_v42  ;;  %v1288_v22 = vmax.f32 %v1286_v27, %v1287_v28  ;;  %v3313_v28 = vld [vmem:[%s3521_s2] ss:$0 sm:$0xff]  ;;  %s2414_s2 = smov [#allocation2]  }
 0x1c6   :  { %v1728_v37 = vrot.slane %v1727_v44, 4  ;;  %v824_v30 = vcombine.high %v696_v6, %v696_v6  ;;  %v1265_v57 = vsel %vm928_vm2, %v696_v6, -inf  ;;  %v3293_v8 = vmax.f32 %v2003_v25, %v2004_v53  ;;  %s2130_s13 = sshll.u32 %s2414_s2, 4  ;;  %s2131_s13 = int_to_ptr.vmem [resolvable:$true] %s2130_s13 }
 0x1c7   :  { %v1902_v46 = vmax.f32 %v3229_v52, %v3278_v50  ;;  %v1887_v10 = vsel %vm1825_vm3, %v1243_v3, -inf  ;;  %v1735_v32 = vrot.slane %v1734_v11, 4  ;;  %v1894_v19 = vsel %vm1825_vm3, %v1250_v7, -inf  ;;  %s2392_s14 = scalar_lea.vmem %s2131_s13, 512  ;;  %p2397_p1 = scmp.lt.s32.totalorder %s2131_s13, %s2131_s13 }
 0x1c8   :  { %v1690_v38 = vrot.slane %v1689_v47, 1  ;;  %v1283_v58 = vmax.f32 %v1281_v61, %v1282_v13  ;;  %v1266_v49 = vrot.slane %v1265_v57, 4  ;;  %v2014_v60 = vmax.f32 %v3247_v12, %v3286_v36  ;;  %p2393_p0 = scmp.ne.s32.totalorder %s2131_s13, %s2392_s14  ;;  %p2398_p2 = scmp.lt.s32.totalorder %s2392_s14, %s2392_s14 }
 0x1c9   :  { %v3304_v45 = vsel %vm1825_vm3, %v1712_v29, -inf  ;;  %v1697_v5 = vrot.slane %v1696_v20, 1  ;;  %v1289_v25 = vrot.slane %v1288_v22, 2  ;;  %v1729_v52 = vmax.f32 %v1727_v44, %v1728_v37 }
 0x1ca   :  { %3536 = vst [vmem:[#allocation6_spill] sm:$0xff] %v3304_v45  ;;  %v1272_v35 = vsel %vm928_vm2, %v824_v30, -inf  ;;  %v728_v41 = vmax.f32 %v634_v51, 0.0  ;;  %v1888_v27 = vmax.f32 %v3257_v24, %v1887_v10  ;;  %v1895_v14 = vmax.f32 %v3262_v31, %v1894_v19  ;;  %v2372_v24 = vpop.f32.mrf.mxu1  ;;  %p2399_p3 = por %p2398_p2, %p2397_p1 }
 0x1cb   :  { %v1736_v48 = vmax.f32 %v1734_v11, %v1735_v32  ;;  %v1273_v9 = vrot.slane %v1272_v35, 4  ;;  %v1691_v61 = vmax.f32 %v1689_v47, %v1690_v38  ;;  %v1284_v15 = vrot.slane %v1283_v58, 1 }
 0x1cc   :  { %v1267_v62 = vmax.f32 %v1265_v57, %v1266_v49  ;;  %v856_v23 = vcombine.high %v728_v41, %v728_v41  ;;  %v1698_v39 = vmax.f32 %v1696_v20, %v1697_v5  ;;  %v1713_v53 = vsel %vm928_vm2, %v728_v41, -inf  ;;  %p2400_p4 = pnand %p2399_p3, %p2393_p0 }
 0x1cd   :  { %v1274_v59 = vmax.f32 %v1272_v35, %v1273_v9  ;;  %v489_v40 = vadd.f32 %v3313_v28, %v2324_v16  ;;  %v1290_v6 = vmax.f32 %v1288_v22, %v1289_v25  ;;  %v1730_v42 = vrot.slane %v1729_v52, 2 }
 0x1ce   :  { %v1720_v50 = vsel %vm928_vm2, %v856_v23, -inf  ;;  %v2096_v3 = vsel %vm2082_vm4, %v1895_v14, %v1888_v27  ;;  %v1737_v44 = vrot.slane %v1736_v48, 2  ;;  %v1714_v7 = vrot.slane %v1713_v53, 4 }
 0x1cf   :  { %v699_v47 = vmax.f32 %v489_v40, 0.0  ;;  %v1999_v13 = vsel %vm1825_vm3, %v1691_v61, -inf  ;;  %v1268_v11 = vrot.slane %v1267_v62, 2  ;;  %v1275_v29 = vrot.slane %v1274_v59, 2  ;;  %v483_v61 = vpop.f32.mrf.mxu0 }
 0x1d0   :  { %v649_v20 = vadd.f32 %v3313_v28, %v2372_v24  ;;  %v2006_v51 = vsel %vm1825_vm3, %v1698_v39, -inf  ;;  %v1285_v37 = vmax.f32 %v1283_v58, %v1284_v15  ;;  %v1721_v30 = vrot.slane %v1720_v50, 4 }
 0x1d1   :  { %v827_v57 = vcombine.high %v699_v47, %v699_v47  ;;  %v1291_v22 = vrot.slane %v1290_v6, 1  ;;  %v1731_v10 = vmax.f32 %v1729_v52, %v1730_v42  ;;  %v1307_v32 = vsel %vm928_vm2, %v699_v47, -inf }
 0x1d2   :  { %v731_v19 = vmax.f32 %v649_v20, 0.0  ;;  %v1738_v38 = vmax.f32 %v1736_v48, %v1737_v44  ;;  %v1715_v49 = vmax.f32 %v1713_v53, %v1714_v7  ;;  %v1308_v5 = vrot.slane %v1307_v32, 4  ;;  %v643_v53 = vpop.f32.mrf.mxu1 }
 0x1d3   :  { %v1314_v25 = vsel %vm928_vm2, %v827_v57, -inf  ;;  %v3326_v35 = vsel %vm2084_vm5, %v1902_v46, %v2096_v3  ;;  %v2007_v41 = vmax.f32 %v3293_v8, %v2006_v51  ;;  %v1269_v16 = vmax.f32 %v1267_v62, %v1268_v11 }
 0x1d4   :  { %v1276_v27 = vmax.f32 %v1274_v59, %v1275_v29  ;;  %v1722_v58 = vmax.f32 %v1720_v50, %v1721_v30  ;;  %v1315_v14 = vrot.slane %v1314_v25, 4  ;;  %v859_v9 = vcombine.high %v731_v19, %v731_v19 }
 0x1d5   :  { %v1755_v52 = vsel %vm928_vm2, %v731_v19, -inf  ;;  %v2000_v15 = vmax.f32 %v3274_v4, %v1999_v13  ;;  %v1292_v48 = vmax.f32 %v1290_v6, %v1291_v22  ;;  %v1732_v23 = vrot.slane %v1731_v10, 1 }
 0x1d6   :  { %v1309_v39 = vmax.f32 %v1307_v32, %v1308_v5  ;;  %v3332_v40 = vsel %vm1825_vm3, %v1285_v37, -inf  ;;  %v1739_v46 = vrot.slane %v1738_v38, 1  ;;  %v1716_v24 = vrot.slane %v1715_v49, 2 }
 0x1d7   :  { %v1756_v8 = vrot.slane %v1755_v52, 4  ;;  %v2110_v62 = vsel %vm2082_vm4, %v2007_v41, %v2000_v15  ;;  %v1270_v59 = vrot.slane %v1269_v16, 1  ;;  %v1277_v42 = vrot.slane %v1276_v27, 1 }
 0x1d8   :  { %v484_v50 = vadd.f32 %v3313_v28, %v483_v61  ;;  %v1723_v3 = vrot.slane %v1722_v58, 2  ;;  %v1316_v44 = vmax.f32 %v1314_v25, %v1315_v14  ;;  %v1762_v4 = vsel %vm928_vm2, %v859_v9, -inf }
 0x1d9   :  { %v644_v6 = vadd.f32 %v3313_v28, %v643_v53  ;;  %v3339_v7 = vsel %vm1825_vm3, %v1292_v48, -inf  ;;  %v1733_v47 = vmax.f32 %v1731_v10, %v1732_v23  ;;  %v1310_v13 = vrot.slane %v1309_v39, 2  ;;  %v2327_v48 = vpop.f32.mrf.mxu0 }
 0x1da   :  { %v698_v11 = vmax.f32 %v484_v50, 0.0  ;;  %v1740_v29 = vmax.f32 %v1738_v38, %v1739_v46  ;;  %v1717_v20 = vmax.f32 %v1715_v49, %v1716_v24  ;;  %v1757_v51 = vmax.f32 %v1755_v52, %v1756_v8 }
 0x1db   :  { %v730_v37 = vmax.f32 %v644_v6, 0.0  ;;  %v1271_v30 = vmax.f32 %v1269_v16, %v1270_v59  ;;  %v1763_v57 = vrot.slane %v1762_v4, 4  ;;  %v1278_v19 = vmax.f32 %v1276_v27, %v1277_v42 }
 0x1dc   :  { %v826_v22 = vcombine.high %v698_v11, %v698_v11  ;;  %v1293_v32 = vsel %vm928_vm2, %v698_v11, -inf  ;;  %v1724_v5 = vmax.f32 %v1722_v58, %v1723_v3  ;;  %v1317_v25 = vrot.slane %v1316_v44, 2 }
 0x1dd   :  { %v1294_v41 = vrot.slane %v1293_v32, 4  ;;  %v1311_v14 = vmax.f32 %v1309_v39, %v1310_v13  ;;  %v858_v61 = vcombine.high %v730_v37, %v730_v37  ;;  %v1741_v10 = vsel %vm928_vm2, %v730_v37, -inf }
 0x1de   :  { %v1300_v9 = vsel %vm928_vm2, %v826_v22, -inf  ;;  %v1718_v15 = vrot.slane %v1717_v20, 1  ;;  %v1758_v38 = vrot.slane %v1757_v51, 2  ;;  %v3348_v16 = vsel %vm2084_vm5, %v2014_v60, %v2110_v62  ;;  %v2375_v60 = vpop.f32.mrf.mxu1 }
 0x1df   :  { %v1295_v49 = vmax.f32 %v1293_v32, %v1294_v41  ;;  %v1301_v52 = vrot.slane %v1300_v9, 4  ;;  %v3351_v27 = vsel %vm1825_vm3, %v1733_v47, -inf  ;;  %v1764_v58 = vmax.f32 %v1762_v4, %v1763_v57  ;;  %v493_v4 = vpop.f32.mrf.mxu0 }
 0x1e0   :  { %v1742_v23 = vrot.slane %v1741_v10, 4  ;;  %v3354_v39 = vsel %vm1825_vm3, %v1740_v29, -inf  ;;  %v1725_v53 = vrot.slane %v1724_v5, 1  ;;  %v1318_v46 = vmax.f32 %v1316_v44, %v1317_v25 }
 0x1e1   :  { %v1302_v24 = vmax.f32 %v1300_v9, %v1301_v52  ;;  %v3357_v8 = vsel %vm1825_vm3, %v1271_v30, -inf  ;;  %v1312_v59 = vrot.slane %v1311_v14, 1  ;;  %v1748_v12 = vsel %vm928_vm2, %v858_v61, -inf }
 0x1e2   :  { %v499_v36 = vadd.f32 %v3313_v28, %v2327_v48  ;;  %v3362_v62 = vsel %vm1825_vm3, %v1278_v19, -inf  ;;  %v1719_v42 = vmax.f32 %v1717_v20, %v1718_v15  ;;  %v1759_v50 = vmax.f32 %v1757_v51, %v1758_v38 }
 0x1e3   :  { %v1296_v3 = vrot.slane %v1295_v49, 2  ;;  %v1765_v6 = vrot.slane %v1764_v58, 2  ;;  %v1743_v47 = vmax.f32 %v1741_v10, %v1742_v23  ;;  %v1749_v44 = vrot.slane %v1748_v12, 4 }
 0x1e4   :  { %v701_v13 = vmax.f32 %v499_v36, 0.0  ;;  %v1726_v11 = vmax.f32 %v1724_v5, %v1725_v53  ;;  %v1319_v29 = vrot.slane %v1318_v46, 1  ;;  %v1303_v37 = vrot.slane %v1302_v24, 2 }
 0x1e5   :  { %v659_v30 = vadd.f32 %v3313_v28, %v2375_v60  ;;  %v1313_v57 = vmax.f32 %v1311_v14, %v1312_v59  ;;  %v494_v19 = vadd.f32 %v3313_v28, %v493_v4  ;;  %v1760_v25 = vrot.slane %v1759_v50, 1 }
 0x1e6   :  { %v829_v22 = vcombine.high %v701_v13, %v701_v13  ;;  %v1335_v32 = vsel %vm928_vm2, %v701_v13, -inf  ;;  %v1297_v20 = vmax.f32 %v1295_v49, %v1296_v3  ;;  %v1766_v9 = vmax.f32 %v1764_v58, %v1765_v6 }
 0x1e7   :  { %v1336_v51 = vrot.slane %v1335_v32, 4  ;;  %v733_v41 = vmax.f32 %v659_v30, 0.0  ;;  %v1744_v61 = vrot.slane %v1743_v47, 2  ;;  %v1750_v10 = vmax.f32 %v1748_v12, %v1749_v44 }
 0x1e8   :  { %v1342_v15 = vsel %vm928_vm2, %v829_v22, -inf  ;;  %v3369_v5 = vsel %vm1825_vm3, %v1719_v42, -inf  ;;  %v1304_v38 = vmax.f32 %v1302_v24, %v1303_v37  ;;  %v1320_v48 = vmax.f32 %v1318_v46, %v1319_v29  ;;  %v653_v24 = vpop.f32.mrf.mxu1 }
 0x1e9   :  { %v1337_v52 = vmax.f32 %v1335_v32, %v1336_v51  ;;  %v1343_v14 = vrot.slane %v1342_v15, 4  ;;  %v3372_v23 = vsel %vm1825_vm3, %v1313_v57, -inf  ;;  %v861_v53 = vcombine.high %v733_v41, %v733_v41 }
 0x1ea   :  { %v700_v59 = vmax.f32 %v494_v19, 0.0  ;;  %v1761_v49 = vmax.f32 %v1759_v50, %v1760_v25  ;;  %v1298_v36 = vrot.slane %v1297_v20, 1  ;;  %v1783_v58 = vsel %vm928_vm2, %v733_v41, -inf  ;;  %v2330_v41 = vpop.f32.mrf.mxu0 }
 0x1eb   :  { %v1344_v60 = vmax.f32 %v1342_v15, %v1343_v14  ;;  %v3376_v12 = vsel %vm1825_vm3, %v1726_v11, -inf  ;;  %v1767_v3 = vrot.slane %v1766_v9, 1  ;;  %v1745_v42 = vmax.f32 %v1743_v47, %v1744_v61 }
 0x1ec   :  { %v1751_v4 = vrot.slane %v1750_v10, 2  ;;  %v1305_v6 = vrot.slane %v1304_v38, 1  ;;  %v1338_v44 = vrot.slane %v1337_v52, 2  ;;  %v1790_v13 = vsel %vm928_vm2, %v861_v53, -inf  ;;  %v503_v45 = vpop.f32.mrf.mxu0 }
 0x1ed   :  { %v3382_v50 = vsel %vm1825_vm3, %v1320_v48, -inf  ;;  %v1345_v29 = vrot.slane %v1344_v60, 2  ;;  %v1784_v37 = vrot.slane %v1783_v58, 4  ;;  %v828_v30 = vcombine.high %v700_v59, %v700_v59 }
 0x1ee   :  { %v3385_v11 = vsel %vm1825_vm3, %v1761_v49, -inf  ;;  %v1299_v57 = vmax.f32 %v1297_v20, %v1298_v36  ;;  %v1321_v47 = vsel %vm928_vm2, %v700_v59, -inf  ;;  %v654_v22 = vadd.f32 %v3313_v28, %v653_v24 }
 0x1ef   :  { %v1746_v32 = vrot.slane %v1745_v42, 1  ;;  %v1752_v19 = vmax.f32 %v1750_v10, %v1751_v4  ;;  %v1791_v25 = vrot.slane %v1790_v13, 4  ;;  %v1322_v51 = vrot.slane %v1321_v47, 4 }
 0x1f0   :  { %v1306_v15 = vmax.f32 %v1304_v38, %v1305_v6  ;;  %v1339_v14 = vmax.f32 %v1337_v52, %v1338_v44  ;;  %v1328_v48 = vsel %vm928_vm2, %v828_v30, -inf  ;;  %v1346_v53 = vmax.f32 %v1344_v60, %v1345_v29 }
 0x1f1   :  { %v1785_v49 = vmax.f32 %v1783_v58, %v1784_v37  ;;  %v1323_v31 = vmax.f32 %v1321_v47, %v1322_v51  ;;  %v1329_v20 = vrot.slane %v1328_v48, 4  ;;  %v1768_v36 = vmax.f32 %v1766_v9, %v1767_v3 }
 0x1f2   :  { %v732_v24 = vmax.f32 %v654_v22, 0.0  ;;  %v509_v10 = vadd.f32 %v3313_v28, %v2330_v41  ;;  %v3396_v4 = vsel %vm1825_vm3, %v1299_v57, -inf  ;;  %v1747_v54 = vmax.f32 %v1745_v42, %v1746_v32 }
 0x1f3   :  { %v1753_v61 = vrot.slane %v1752_v19, 1  ;;  %v1792_v38 = vmax.f32 %v1790_v13, %v1791_v25  ;;  %v1324_v52 = vrot.slane %v1323_v31, 2  ;;  %v1330_v6 = vmax.f32 %v1328_v48, %v1329_v20  ;;  %v2378_v48 = vpop.f32.mrf.mxu1 }
 0x1f4   :  { %v860_v44 = vcombine.high %v732_v24, %v732_v24  ;;  %v1769_v60 = vsel %vm928_vm2, %v732_v24, -inf  ;;  %v3400_v58 = vsel %vm1825_vm3, %v1306_v15, -inf  ;;  %v1340_v9 = vrot.slane %v1339_v14, 1 }
 0x1f5   :  { %v1347_v3 = vrot.slane %v1346_v53, 1  ;;  %v1786_v29 = vrot.slane %v1785_v49, 2  ;;  %v1331_v37 = vrot.slane %v1330_v6, 2  ;;  %v1770_v30 = vrot.slane %v1769_v60, 4 }
 0x1f6   :  { %v1776_v47 = vsel %vm928_vm2, %v860_v44, -inf  ;;  %v703_v57 = vmax.f32 %v509_v10, 0.0  ;;  %v3404_v42 = vsel %vm1825_vm3, %v1768_v36, -inf  ;;  %v3409_v22 = vsel %vm1825_vm3, %v1747_v54, -inf }
 0x1f7   :  { %v1793_v32 = vrot.slane %v1792_v38, 2  ;;  %v1754_v25 = vmax.f32 %v1752_v19, %v1753_v61  ;;  %v1325_v51 = vmax.f32 %v1323_v31, %v1324_v52  ;;  %v1777_v41 = vrot.slane %v1776_v47, 4 }
 0x1f8   :  { %v831_v15 = vcombine.high %v703_v57, %v703_v57  ;;  %v1919_v20 = vmax.f32 %v3362_v62, %v3400_v58  ;;  %v1341_v24 = vmax.f32 %v1339_v14, %v1340_v9  ;;  %v1332_v10 = vmax.f32 %v1330_v6, %v1331_v37 }
 0x1f9   :  { %v1363_v36 = vsel %vm928_vm2, %v703_v57, -inf  ;;  %v1348_v44 = vmax.f32 %v1346_v53, %v1347_v3  ;;  %v1787_v59 = vmax.f32 %v1785_v49, %v1786_v29  ;;  %v1771_v46 = vmax.f32 %v1769_v60, %v1770_v30 }
 0x1fa   :  { %v1364_v13 = vrot.slane %v1363_v36, 4  ;;  %v1794_v19 = vmax.f32 %v1792_v38, %v1793_v32  ;;  %v1370_v31 = vsel %vm928_vm2, %v831_v15, -inf  ;;  %v669_v61 = vadd.f32 %v3313_v28, %v2378_v48 }
 0x1fb   :  { %v3419_v52 = vsel %vm1825_vm3, %v1754_v25, -inf  ;;  %v1326_v62 = vrot.slane %v1325_v51, 1  ;;  %v1778_v14 = vmax.f32 %v1776_v47, %v1777_v41  ;;  %v1333_v58 = vrot.slane %v1332_v10, 1 }
 0x1fc   :  { %v1365_v6 = vmax.f32 %v1363_v36, %v1364_v13  ;;  %v1371_v53 = vrot.slane %v1370_v31, 4  ;;  %v735_v49 = vmax.f32 %v669_v61, 0.0  ;;  %v504_v60 = vadd.f32 %v3313_v28, %v503_v45 }
 0x1fd   :  { %v1927_v9 = vsel %vm1825_vm3, %v1341_v24, -inf  ;;  %v1934_v3 = vsel %vm1825_vm3, %v1348_v44, -inf  ;;  %v1788_v38 = vrot.slane %v1787_v59, 1  ;;  %v1772_v29 = vrot.slane %v1771_v46, 2 }
 0x1fe   :  { %v1795_v37 = vrot.slane %v1794_v19, 1  ;;  %v1366_v30 = vrot.slane %v1365_v6, 2  ;;  %v1372_v57 = vmax.f32 %v1370_v31, %v1371_v53  ;;  %v863_v32 = vcombine.high %v735_v49, %v735_v49 }
 0x1ff   :  { %v1327_v25 = vmax.f32 %v1325_v51, %v1326_v62  ;;  %v1779_v15 = vrot.slane %v1778_v14, 2  ;;  %v1811_v47 = vsel %vm928_vm2, %v735_v49, -inf  ;;  %v702_v13 = vmax.f32 %v504_v60, 0.0 }
 0x200   :  { %v3537_v41 = vmax.f32 %v3332_v40, %v3372_v23  ;;  %v1334_v45 = vmax.f32 %v1332_v10, %v1333_v58  ;;  %v1812_v24 = vrot.slane %v1811_v47, 4  ;;  %v1818_v36 = vsel %vm928_vm2, %v863_v32, -inf  ;;  %v663_v40 = vpop.f32.mrf.mxu1 }
 0x201   :  { %v1773_v44 = vmax.f32 %v1771_v46, %v1772_v29  ;;  %v1373_v61 = vrot.slane %v1372_v57, 2  ;;  %v1819_v54 = vrot.slane %v1818_v36, 4  ;;  %v830_v34 = vcombine.high %v702_v13, %v702_v13 }
 0x202   :  { %v3428_v48 = vmax.f32 %v3537_v41, %v1927_v9  ;;  %v3538_v51 = vmax.f32 %v3339_v7, %v3382_v50  ;;  %v3436_v62 = vmax.f32 %v1787_v59, %v1788_v38  ;;  %v1367_v53 = vmax.f32 %v1365_v6, %v1366_v30 }
 0x203   :  { %v1813_v49 = vmax.f32 %v1811_v47, %v1812_v24  ;;  %v3438_v23 = vmax.f32 %v1794_v19, %v1795_v37  ;;  %v1913_v10 = vsel %vm1825_vm3, %v1327_v25, -inf  ;;  %v1780_v58 = vmax.f32 %v1778_v14, %v1779_v15 }
 0x204   :  { %v3434_v31 = vmax.f32 %v3538_v51, %v1934_v3  ;;  %v1349_v46 = vsel %vm928_vm2, %v702_v13, -inf  ;;  %v1920_v60 = vsel %vm1825_vm3, %v1334_v45, -inf  ;;  %v1820_v9 = vmax.f32 %v1818_v36, %v1819_v54 }
 0x205   :  { %v1350_v29 = vrot.slane %v1349_v46, 4  ;;  %v1356_v7 = vsel %vm928_vm2, %v830_v34, -inf  ;;  %v1774_v50 = vrot.slane %v1773_v44, 1  ;;  %v1374_v3 = vmax.f32 %v1372_v57, %v1373_v61 }
 0x206   :  { %v1357_v59 = vrot.slane %v1356_v7, 4  ;;  %v664_v6 = vadd.f32 %v3313_v28, %v663_v40  ;;  %v3539_v19 = vmax.f32 %v3357_v8, %v3396_v4  ;;  %v1368_v37 = vrot.slane %v1367_v53, 1 }
 0x207   :  { %v1814_v30 = vrot.slane %v1813_v49, 2  ;;  %v1351_v14 = vmax.f32 %v1349_v46, %v1350_v29  ;;  %v1921_v32 = vmax.f32 %v1919_v20, %v1920_v60  ;;  %v3540_v54 = vmax.f32 %v3242_v17, %v3281_v43 }
 0x208   :  { %v1914_v38 = vmax.f32 %v3539_v19, %v1913_v10  ;;  %v1358_v25 = vmax.f32 %v1356_v7, %v1357_v59  ;;  %v734_v15 = vmax.f32 %v664_v6, 0.0  ;;  %v1781_v57 = vrot.slane %v1780_v58, 1 }
 0x209   :  { %v2098_v34 = vsel %vm2086_vm6, %v3540_v54, %v3326_v35  ;;  %v1821_v47 = vrot.slane %v1820_v9, 2  ;;  %v1352_v13 = vrot.slane %v1351_v14, 2  ;;  %v1775_v28 = vmax.f32 %v1773_v44, %v1774_v50 }
 0x20a   :  { %v1375_v41 = vrot.slane %v1374_v3, 1  ;;  %v1359_v8 = vrot.slane %v1358_v25, 2  ;;  %v862_v4 = vcombine.high %v734_v15, %v734_v15  ;;  %v1369_v45 = vmax.f32 %v1367_v53, %v1368_v37 }
 0x20b   :  { %v1815_v24 = vmax.f32 %v1813_v49, %v1814_v30  ;;  %v1353_v36 = vmax.f32 %v1351_v14, %v1352_v13  ;;  %v1797_v20 = vsel %vm928_vm2, %v734_v15, -inf  ;;  %v3541_v43 = vmax.f32 %v3031_v33, %v3073_v55 }
 0x20c   :  { %v1360_v61 = vmax.f32 %v1358_v25, %v1359_v8  ;;  %v1798_v51 = vrot.slane %v1797_v20, 4  ;;  %v1804_v17 = vsel %vm928_vm2, %v862_v4, -inf  ;;  %v1822_v40 = vmax.f32 %v1820_v9, %v1821_v47 }
 0x20d   :  { %v2093_v35 = vsel %vm2092_vm9, %v3541_v43, %v3126_v26  ;;  %v1354_v44 = vrot.slane %v1353_v36, 1  ;;  %v1805_v10 = vrot.slane %v1804_v17, 4  ;;  %v1782_v46 = vmax.f32 %v1780_v58, %v1781_v57 }
 0x20e   :  { %v1376_v53 = vmax.f32 %v1374_v3, %v1375_v41  ;;  %v1361_v49 = vrot.slane %v1360_v61, 1  ;;  %v1799_v60 = vmax.f32 %v1797_v20, %v1798_v51  ;;  %v1929_v29 = vsel %vm1825_vm3, %v1369_v45, -inf }
 0x20f   :  { %v1355_v7 = vmax.f32 %v1353_v36, %v1354_v44  ;;  %v1806_v50 = vmax.f32 %v1804_v17, %v1805_v10  ;;  %v3542_v59 = vmax.f32 %v3036_v0, %v3081_v56  ;;  %v1816_v33 = vrot.slane %v1815_v24, 1 }
 0x210   :  { %v1362_v55 = vmax.f32 %v1360_v61, %v1361_v49  ;;  %v1800_v26 = vrot.slane %v1799_v60, 2  ;;  %v3543_v9 = vmax.f32 %v3041_v21, %v3097_v1  ;;  %v1823_v3 = vrot.slane %v1822_v40, 1 }
 0x211   :  { %v2095_v6 = vsel %vm2094_vm10, %v3542_v59, %v2093_v35  ;;  %v1915_v19 = vsel %vm1825_vm3, %v1355_v7, -inf  ;;  %v1807_v37 = vrot.slane %v1806_v50, 2  ;;  %v3544_v0 = vmax.f32 %v3046_v63, %v3100_v2 }
 0x212   :  { %v2108_v58 = vsel %vm2092_vm9, %v3543_v9, %v3140_v18  ;;  %2121 = vst.msk [vmem:[#allocation2] sm:$0xff] %vm1825_vm3, %v2095_v6  ;;  %v1936_v30 = vsel %vm1825_vm3, %v1376_v53, -inf  ;;  %v1916_v14 = vmax.f32 %v1914_v38, %v1915_v19  ;;  %v1922_v25 = vsel %vm1825_vm3, %v1362_v55, -inf }
 0x213   :  { %v2109_v56 = vsel %vm2094_vm10, %v3544_v0, %v2108_v58  ;;  %v1801_v54 = vmax.f32 %v1799_v60, %v1800_v26  ;;  %v2025_v21 = vsel %vm1825_vm3, %v1775_v28, -inf  ;;  %v2032_v1 = vsel %vm1825_vm3, %v1782_v46, -inf }
 0x214   :  { %2123 = vst.msk [vmem:[#allocation2 + $0x10] sm:$0xff] %vm1825_vm3, %v2109_v56  ;;  %v1923_v18 = vmax.f32 %v1921_v32, %v1922_v25  ;;  %v1808_v15 = vmax.f32 %v1806_v50, %v1807_v37  ;;  %v1930_v57 = vmax.f32 %v3428_v48, %v1929_v29  ;;  %v1817_v47 = vmax.f32 %v1815_v24, %v1816_v33 }
 0x215   :  { %v2099_v63 = vsel %vm2088_vm7, %v1916_v14, %v2098_v34  ;;  %v1802_v2 = vrot.slane %v1801_v54, 1  ;;  %v1937_v13 = vmax.f32 %v3434_v31, %v1936_v30  ;;  %v1824_v38 = vmax.f32 %v1822_v40, %v1823_v3 }
 0x216   :  { %v2100_v41 = vsel %vm2090_vm8, %v1923_v18, %v2099_v63  ;;  %v1809_v8 = vrot.slane %v1808_v15, 1  ;;  %v2031_v4 = vmax.f32 %v3376_v12, %v3419_v52  ;;  %v2039_v28 = vsel %vm1825_vm3, %v3436_v62, -inf }
 0x217   :  { %v1803_v32 = vmax.f32 %v1801_v54, %v1802_v2  ;;  %v2101_v45 = vsel %vm2092_vm9, %v1930_v57, %v2100_v41  ;;  %v2046_v48 = vsel %vm1825_vm3, %v3438_v23, -inf  ;;  %v3545_v34 = vmax.f32 %v3369_v5, %v3409_v22 }
 0x218   :  { %v1810_v24 = vmax.f32 %v1808_v15, %v1809_v8  ;;  %v2102_v36 = vsel %vm2094_vm10, %v1937_v13, %v2101_v45  ;;  %v2045_v20 = vmax.f32 %v3354_v39, %v3404_v42  ;;  %v2033_v12 = vmax.f32 %v2031_v4, %v2032_v1  ;;  %v3547_v39 = vld [vmem:[#allocation5_spill] sm:$0xff]  ;;  %v3548_v42 = vld [vmem:[#allocation6_spill] sm:$0xff] }
 0x219   :  { %v2026_v31 = vmax.f32 %v3545_v34, %v2025_v21  ;;  %v2041_v52 = vsel %vm1825_vm3, %v1817_v47, -inf  ;;  %v2027_v62 = vsel %vm1825_vm3, %v1803_v32, -inf  ;;  %2122 = vst.msk [vmem:[#allocation2 + $0x8] sm:$0xff] %vm1825_vm3, %v2102_v36  ;;  %v3546_v23 = vmax.f32 %v3351_v27, %v3385_v11 }
 0x21a   :  { %v2048_v5 = vsel %vm1825_vm3, %v1824_v38, -inf  ;;  %v2034_v51 = vsel %vm1825_vm3, %v1810_v24, -inf  ;;  %v2047_v17 = vmax.f32 %v2045_v20, %v2046_v48  ;;  %v3549_v35 = vmax.f32 %v3547_v39, %v3548_v42 }
 0x21b   :  { %v2040_v61 = vmax.f32 %v3546_v23, %v2039_v28  ;;  %v2028_v22 = vmax.f32 %v2026_v31, %v2027_v62  ;;  %v2035_v43 = vmax.f32 %v2033_v12, %v2034_v51 }
 0x21c   :  { %v2112_v40 = vsel %vm2086_vm6, %v3549_v35, %v3348_v16  ;;  %v2049_v27 = vmax.f32 %v2047_v17, %v2048_v5 }
 0x21d   :  { %v2042_v44 = vmax.f32 %v2040_v61, %v2041_v52  ;;  %v2113_v10 = vsel %vm2088_vm7, %v2028_v22, %v2112_v40 }
 0x21e   :  { %v2114_v11 = vsel %vm2090_vm8, %v2035_v43, %v2113_v10 }
 0x21f   :  { %v2115_v46 = vsel %vm2092_vm9, %v2042_v44, %v2114_v11 }
 0x220   :  { %v2116_v53 = vsel %vm2094_vm10, %v2049_v27, %v2115_v46 }
 0x221   :  { %2124 = vst.msk [vmem:[#allocation2 + $0x18] sm:$0xff] %vm1825_vm3, %v2116_v53 }
 0x222   :  { %2403 = shalt.err (!%p2400_p4)
}
 0x223   :  { %s2415_s15 = smov 128   ;;  %s2416_s16 = smov 8  }
 0x224   :  { %2136 = dma.vmem_to_hbm [thread:$0]  %s2131_s13, 512, %s3522_s3, [#allocation3], %s2415_s15, %s2415_s15, %s2416_s16  }
 0x225   :  { %2412 = dma.done.wait [#allocation3], 512  }
 0x226   :  { %2413 = vsyncadd [#allocation3], 4294966784 }
 0x227   :  { %2140 = vsyncpa [#allocation3], 1 }

</bundles_post_ra>
